<compile_context>
chip_gen: v5e
topology: v5e:2x2
jax: 0.10.0
libtpu: 0.0.40
codegen_flags: <defaults>
</compile_context>

<pallas_src>
import math
import functools

import jax
import jax.numpy as jnp
import numpy as np
from jax import lax
from jax.experimental import pallas as pl
from jax.experimental.pallas import tpu as pltpu


# Order of bias / LayerNorm segments inside the packed bias slab.
_BIAS_ORDER = (
    "be1", "be2", "be3", "be4",          # embedder biases
    "bq1", "bkv1", "bo1",                # attn1 (k|v biases fused)
    "bl1", "g1", "bb1",                  # linear1 bias, ln1 gamma/beta
    "bqkv2", "bo2",                      # attn2 (q|k|v biases fused)
    "bf1", "bf2",                        # feed-forward biases
    "g2", "bb2",                         # ln2 gamma/beta
)


# ----------------------------- Pallas kernel ------------------------------ #
def _encoder_layer_kernel(x_ref, src_ref,
                          we1, we2, we3, we4,
                          wq1, wkv1, wo1, wl1,
                          wqkv2, wo2, wf1, wf2,
                          bias_ref, out_ref,
                          *, heads, n_rows, m_rows, bias_widths):
    L = x_ref.shape[-1]                   # d_latent
    d_k = L // heads
    R = x_ref.shape[0]                    # Bblk * N latent rows in this block
    Bblk = R // n_rows

    # ---- bias / LayerNorm slab: read once, bind every segment to a local ----
    bvec = bias_ref[...]                  # (n_seg, W) f32
    idx = {name: i for i, name in enumerate(_BIAS_ORDER)}

    def seg(name):
        i = idx[name]
        return bvec[i:i + 1, :bias_widths[i]]          # (1, d) f32

    be1, be2, be3, be4 = seg("be1"), seg("be2"), seg("be3"), seg("be4")
    bq1, bkv1, bo1 = seg("bq1"), seg("bkv1"), seg("bo1")
    bl1, g1, bb1 = seg("bl1"), seg("g1"), seg("bb1")
    bqkv2, bo2 = seg("bqkv2"), seg("bo2")
    bf1, bf2 = seg("bf1"), seg("bf2")
    g2, bb2 = seg("g2"), seg("bb2")

    def mm(a_bf16, w_ref):
        # bf16 operands (weights pre-cast on host), f32 MXU accumulation.
        return jnp.dot(a_bf16, w_ref[...], preferred_element_type=jnp.float32)

    def layer_norm(z, g, b):
        mu = jnp.mean(z, axis=-1, keepdims=True)
        var = jnp.mean((z - mu) ** 2, axis=-1, keepdims=True)
        return (z - mu) * lax.rsqrt(var + 1e-5) * g + b

    def attention(q_bf, kv_bf, k_off, v_off, kv_rows):
        # q_bf  : (R, >=L) bf16, query heads at lane offset 0 (scale already
        #         folded into the q projection weights on the host)
        # kv_bf : (Bblk*kv_rows, *) bf16 with K at lane offset k_off, V at v_off
        # Only the per-(batch, head) score and P@V dots live in this loop;
        # everything else in the layer is batched over all rows.
        batch_outs = []
        for b in range(Bblk):
            qb = q_bf[b * n_rows:(b + 1) * n_rows]
            kvb = kv_bf[b * kv_rows:(b + 1) * kv_rows]
            head_outs = []
            for h in range(heads):
                qs = qb[:, h * d_k:(h + 1) * d_k]
                ks = kvb[:, k_off + h * d_k:k_off + (h + 1) * d_k]
                vs = kvb[:, v_off + h * d_k:v_off + (h + 1) * d_k]
                s = lax.dot_general(qs, ks, (((1,), (1,)), ((), ())),
                                    preferred_element_type=jnp.float32)
                s = s - jnp.max(s, axis=-1, keepdims=True)
                p = jnp.exp(s)
                p = p * pl.reciprocal(jnp.sum(p, axis=-1, keepdims=True),
                                      approx=True)
                head_outs.append(jnp.dot(p.astype(jnp.bfloat16), vs,
                                         preferred_element_type=jnp.float32))
            batch_outs.append(jnp.concatenate(head_outs, axis=-1))   # (N, L)
        return jnp.concatenate(batch_outs, axis=0)                   # (R, L) f32

    x = x_ref[...].astype(jnp.float32)            # (R, L)   residual path, f32
    src = src_ref[...].astype(jnp.bfloat16)       # (S, d_origin)

    # --- embedder: Linear/ReLU x3 then Linear (bf16 between matmuls) ---
    # TODO(synk): mm(src, we1)/mm(h, we2) are degenerate K=3/K=4 MXU pushes;
    # left on the MXU (it has slack at these shapes) -- verify in a bundle
    # dump before moving them to the VPU.
    h = jax.nn.relu(mm(src, we1) + be1).astype(jnp.bfloat16)
    h = jax.nn.relu(mm(h, we2) + be2).astype(jnp.bfloat16)
    h = jax.nn.relu(mm(h, we3) + be3).astype(jnp.bfloat16)
    src_e = (mm(h, we4) + be4).astype(jnp.bfloat16)                   # (S, C)

    # --- attn1: q from x, fused K|V projection from embedded src ---
    q1 = (mm(x.astype(jnp.bfloat16), wq1) + bq1).astype(jnp.bfloat16)  # (R, L)
    kv1 = (mm(src_e, wkv1) + bkv1).astype(jnp.bfloat16)                # (S, 2L)
    cat1 = attention(q1, kv1, 0, L, m_rows)                            # (R, L)
    lat1 = mm(cat1.astype(jnp.bfloat16), wo1) + bo1                    # (R, C)

    # x1 = ln1(x + linear1(lat1))
    x1 = layer_norm(x + mm(lat1.astype(jnp.bfloat16), wl1) + bl1, g1, bb1)

    # --- attn2: fused Q|K|V self-attention on x1 ---
    qkv2 = (mm(x1.astype(jnp.bfloat16), wqkv2) + bqkv2).astype(jnp.bfloat16)  # (R, 3L)
    cat2 = attention(qkv2, qkv2, L, 2 * L, n_rows)                     # (R, L)
    lat2 = mm(cat2.astype(jnp.bfloat16), wo2) + bo2                    # (R, L)

    # --- feed forward: Linear -> ReLU -> Linear (dropout=0 -> identity) ---
    ffh = jax.nn.relu(mm(lat2.astype(jnp.bfloat16), wf1) + bf1).astype(jnp.bfloat16)
    ffo = mm(ffh, wf2) + bf2                                           # (R, L)

    # x = ln2(x1 + ff)
    out_ref[...] = layer_norm(x1 + ffo, g2, bb2).astype(out_ref.dtype)

    # TODO(synk): additive attention-bias path (weights1/weights2) and
    # dropout > 0 are not implemented (forward defaults: weights=None, dropout=0).


# --------------------------- host-side packing ----------------------------- #
def pack_encoder_params(params, heads):
    """Fuse projection weights, fold the softmax scale into the q projections,
    and pack all bias/LN vectors into one (n_seg, 128) f32 slab."""
    (we1, be1, we2, be2, we3, be3, we4, be4,
     wq1, bq1, wk1, bk1, wv1, bv1, wo1, bo1,
     wl1, bl1, g1, bb1,
     wq2, bq2, wk2, bk2, wv2, bv2, wo2, bo2,
     wf1, bf1, wf2, bf2, g2, bb2) = params

    d_latent = wq1.shape[0]
    scale = 1.0 / math.sqrt(d_latent // heads)
    wq1s, bq1s = wq1 * scale, bq1 * scale      # fold 1/sqrt(d_k) into q proj
    wq2s, bq2s = wq2 * scale, bq2 * scale

    weights = [
        we1, we2, we3, we4,
        wq1s,
        jnp.concatenate([wk1, wv1], axis=1),             # (C, 2L) fused K|V
        wo1, wl1,
        jnp.concatenate([wq2s, wk2, wv2], axis=1),       # (L, 3L) fused Q|K|V
        wo2, wf1, wf2,
    ]
    weights = [w.astype(jnp.bfloat16) for w in weights]

    segs = [
        be1, be2, be3, be4,
        bq1s, jnp.concatenate([bk1, bv1], axis=1), bo1,
        bl1, g1, bb1,
        jnp.concatenate([bq2s, bk2, bv2], axis=1), bo2,
        bf1, bf2,
        g2, bb2,
    ]
    assert len(segs) == len(_BIAS_ORDER)
    widths = [int(s.shape[-1]) for s in segs]
    W = max(128, ((max(widths) + 127) // 128) * 128)
    slab = jnp.zeros((len(segs), W), jnp.float32)
    for i, s in enumerate(segs):
        slab = slab.at[i, :widths[i]].set(s.reshape(-1).astype(jnp.float32))
    return weights, slab, tuple(widths)


def _default_batch_blocks(B):
    """2-way parallel grid on v7x (2 TensorCores per chip), 1 step otherwise."""
    try:
        kind = jax.devices()[0].device_kind.lower()
    except Exception:
        kind = ""
    if B >= 2 and ("v7" in kind or "7x" in kind):
        return 2
    return 1


# ------------------------------ wrapper ----------------------------------- #
def encoder_layer_pallas(x, src, params, heads, *, batch_blocks=None):
    B, N, L = x.shape
    _, M, d_origin = src.shape

    weights, bias_slab, bias_widths = pack_encoder_params(params, heads)

    if batch_blocks is None:
        batch_blocks = _default_batch_blocks(B)
    G = max(1, int(batch_blocks))
    Bpad = G * ((B + G - 1) // G)          # pad so every grid step is full
    if Bpad != B:
        x = jnp.pad(x, ((0, Bpad - B), (0, 0), (0, 0)))
        src = jnp.pad(src, ((0, Bpad - B), (0, 0), (0, 0)))
    Bblk = Bpad // G

    # Row-flattened 2-D slabs: all non-attention math runs once over all rows.
    x2d = x.reshape(Bpad * N, L)
    src2d = src.reshape(Bpad * M, d_origin)

    kernel = functools.partial(_encoder_layer_kernel, heads=heads,
                               n_rows=N, m_rows=M, bias_widths=bias_widths)

    in_specs = [
        pl.BlockSpec((Bblk * N, L), lambda b: (b, 0)),
        pl.BlockSpec((Bblk * M, d_origin), lambda b: (b, 0)),
    ]
    in_specs += [pl.BlockSpec(w.shape, lambda b: (0, 0)) for w in weights]
    in_specs += [pl.BlockSpec(bias_slab.shape, lambda b: (0, 0))]
    out_specs = pl.BlockSpec((Bblk * N, L), lambda b: (b, 0))

    out2d = pl.pallas_call(
        kernel,
        out_shape=jax.ShapeDtypeStruct((Bpad * N, L), jnp.float32),
        grid=(G,),
        in_specs=in_specs,
        out_specs=out_specs,
        compiler_params=pltpu.CompilerParams(
            dimension_semantics=("parallel",)),
    )(x2d, src2d, *weights, bias_slab)

    out = out2d.reshape(Bpad, N, L)
    return out[:B] if Bpad != B else out


# --------------------------- pure-JAX reference ---------------------------- #
def encoder_layer_ref(x, src, params, heads, matmul_dtype=jnp.float32):
    (we1, be1, we2, be2, we3, be3, we4, be4,
     wq1, bq1, wk1, bk1, wv1, bv1, wo1, bo1,
     wl1, bl1, g1, bb1,
     wq2, bq2, wk2, bk2, wv2, bv2, wo2, bo2,
     wf1, bf1, wf2, bf2, g2, bb2) = params

    def mm(a, w):
        return jnp.dot(a.astype(matmul_dtype), w.astype(matmul_dtype),
                       preferred_element_type=jnp.float32)

    def lin(h, w, b):
        return mm(h, w) + b

    def ln(z, g, b):
        mu = z.mean(-1, keepdims=True)
        var = ((z - mu) ** 2).mean(-1, keepdims=True)
        return (z - mu) / jnp.sqrt(var + 1e-5) * g + b

    def mha(q_in, kv_in, wq, bq, wk, bk, wv, bv, wo, bo):
        q, k, v = lin(q_in, wq, bq), lin(kv_in, wk, bk), lin(kv_in, wv, bv)
        B, Nq, L = q.shape
        d_k = L // heads

        def split(t):
            return t.reshape(t.shape[0], t.shape[1], heads, d_k).transpose(0, 2, 1, 3)

        qh, kh, vh = split(q), split(k), split(v)
        s = jnp.einsum('bhqd,bhkd->bhqk',
                       qh.astype(matmul_dtype), kh.astype(matmul_dtype),
                       preferred_element_type=jnp.float32) / math.sqrt(d_k)
        p = jax.nn.softmax(s, axis=-1)
        o = jnp.einsum('bhqk,bhkd->bhqd',
                       p.astype(matmul_dtype), vh.astype(matmul_dtype),
                       preferred_element_type=jnp.float32)
        concat = o.transpose(0, 2, 1, 3).reshape(B, Nq, L)
        return lin(concat, wo, bo)

    h = jax.nn.relu(lin(src, we1, be1))
    h = jax.nn.relu(lin(h, we2, be2))
    h = jax.nn.relu(lin(h, we3, be3))
    src_e = lin(h, we4, be4)

    latent = mha(x, src_e, wq1, bq1, wk1, bk1, wv1, bv1, wo1, bo1)
    x1 = ln(x + lin(latent, wl1, bl1), g1, bb1)
    latent2 = mha(x1, x1, wq2, bq2, wk2, bk2, wv2, bv2, wo2, bo2)
    ffo = lin(jax.nn.relu(lin(latent2, wf1, bf1)), wf2, bf2)
    return ln(x1 + ffo, g2, bb2)


# ------------------------------- main ------------------------------------- #
def _make_linear(key, fan_in, fan_out):
    kw, kb = jax.random.split(key)
    bound = 1.0 / math.sqrt(fan_in)
    w = jax.random.uniform(kw, (fan_in, fan_out), jnp.float32, -bound, bound)
    b = jax.random.uniform(kb, (1, fan_out), jnp.float32, -bound, bound)
    return w, b


if __name__ == "__main__":
    B, N, M = 2, 8, 16
    d_latent, d_channels, heads, d_middle, d_origin = 32, 32, 4, 64, 3

    keys = jax.random.split(jax.random.PRNGKey(0), 17)

    params = []
    # embedder: d_origin -> C/8 -> C/4 -> C/2 -> C
    params += _make_linear(keys[0], d_origin, d_channels // 8)
    params += _make_linear(keys[1], d_channels // 8, d_channels // 4)
    params += _make_linear(keys[2], d_channels // 4, d_channels // 2)
    params += _make_linear(keys[3], d_channels // 2, d_channels)
    # attn1: q (L->L), k (C->L), v (C->L), out (L->C)
    params += _make_linear(keys[4], d_latent, d_latent)
    params += _make_linear(keys[5], d_channels, d_latent)
    params += _make_linear(keys[6], d_channels, d_latent)
    params += _make_linear(keys[7], d_latent, d_channels)
    # linear1: C -> L
    params += _make_linear(keys[8], d_channels, d_latent)
    # ln1: gamma, beta
    params += [jnp.ones((1, d_latent), jnp.float32), jnp.zeros((1, d_latent), jnp.float32)]
    # attn2: q,k,v,out all (L->L)
    params += _make_linear(keys[9], d_latent, d_latent)
    params += _make_linear(keys[10], d_latent, d_latent)
    params += _make_linear(keys[11], d_latent, d_latent)
    params += _make_linear(keys[12], d_latent, d_latent)
    # feed forward: L -> d_middle -> L
    params += _make_linear(keys[13], d_latent, d_middle)
    params += _make_linear(keys[14], d_middle, d_latent)
    # ln2: gamma, beta
    params += [jnp.ones((1, d_latent), jnp.float32), jnp.zeros((1, d_latent), jnp.float32)]
    params = [jnp.asarray(p, jnp.float32) for p in params]

    x = jax.random.normal(keys[15], (B, N, d_latent), jnp.float32)
    src = jax.random.normal(keys[16], (B, M, d_origin), jnp.float32)

    out = encoder_layer_pallas(x, src, params, heads)
    out = jax.block_until_ready(out)

    # Tight check against a precision-matched (bf16-matmul) reference.
    # (Slightly looser than exact-bf16 because the softmax scale is folded into
    #  the bf16 q weights and the softmax uses an approx reciprocal.)
    ref_bf16 = encoder_layer_ref(x, src, params, heads, matmul_dtype=jnp.bfloat16)
    np.testing.assert_allclose(np.asarray(out), np.asarray(ref_bf16),
                               rtol=3e-2, atol=3e-2)
    # Looser sanity check against the full-f32 reference semantics.
    ref_f32 = encoder_layer_ref(x, src, params, heads)
    np.testing.assert_allclose(np.asarray(out), np.asarray(ref_f32),
                               rtol=1e-1, atol=1e-1)

    print("KERNEL_OK")
</pallas_src>

<mosaic_0001>
module attributes {stable_mosaic.version = 11 : i64} {
  func.func @_encoder_layer_kernel(%arg0: i32, %arg1: memref<16x32xf32, #tpu.memory_space<vmem>>, %arg2: memref<32x3xf32, #tpu.memory_space<vmem>>, %arg3: memref<3x4xbf16, #tpu.memory_space<vmem>>, %arg4: memref<4x8xbf16, #tpu.memory_space<vmem>>, %arg5: memref<8x16xbf16, #tpu.memory_space<vmem>>, %arg6: memref<16x32xbf16, #tpu.memory_space<vmem>>, %arg7: memref<32x32xbf16, #tpu.memory_space<vmem>>, %arg8: memref<32x64xbf16, #tpu.memory_space<vmem>>, %arg9: memref<32x32xbf16, #tpu.memory_space<vmem>>, %arg10: memref<32x32xbf16, #tpu.memory_space<vmem>>, %arg11: memref<32x96xbf16, #tpu.memory_space<vmem>>, %arg12: memref<32x32xbf16, #tpu.memory_space<vmem>>, %arg13: memref<32x64xbf16, #tpu.memory_space<vmem>>, %arg14: memref<64x32xbf16, #tpu.memory_space<vmem>>, %arg15: memref<16x128xf32, #tpu.memory_space<vmem>>, %arg16: memref<16x32xf32, #tpu.memory_space<vmem>>) attributes {dimension_semantics = [#tpu.dimension_semantics<parallel>], iteration_bounds = array<i64: 1>, scalar_prefetch = 0 : i64, scratch_operands = 0 : i64, tpu.core_type = #tpu.core_type<tc>, window_params = [{transform_indices = @transform_0, window_bounds = array<i64: 16, 32>}, {transform_indices = @transform_1, window_bounds = array<i64: 32, 3>}, {pipeline_mode = #tpu.pipeline_mode<synchronous>, transform_indices = @transform_2, window_bounds = array<i64: 3, 4>}, {pipeline_mode = #tpu.pipeline_mode<synchronous>, transform_indices = @transform_3, window_bounds = array<i64: 4, 8>}, {pipeline_mode = #tpu.pipeline_mode<synchronous>, transform_indices = @transform_4, window_bounds = array<i64: 8, 16>}, {pipeline_mode = #tpu.pipeline_mode<synchronous>, transform_indices = @transform_5, window_bounds = array<i64: 16, 32>}, {pipeline_mode = #tpu.pipeline_mode<synchronous>, transform_indices = @transform_6, window_bounds = array<i64: 32, 32>}, {pipeline_mode = #tpu.pipeline_mode<synchronous>, transform_indices = @transform_7, window_bounds = array<i64: 32, 64>}, {pipeline_mode = #tpu.pipeline_mode<synchronous>, transform_indices = @transform_8, window_bounds = array<i64: 32, 32>}, {pipeline_mode = #tpu.pipeline_mode<synchronous>, transform_indices = @transform_9, window_bounds = array<i64: 32, 32>}, {pipeline_mode = #tpu.pipeline_mode<synchronous>, transform_indices = @transform_10, window_bounds = array<i64: 32, 96>}, {pipeline_mode = #tpu.pipeline_mode<synchronous>, transform_indices = @transform_11, window_bounds = array<i64: 32, 32>}, {pipeline_mode = #tpu.pipeline_mode<synchronous>, transform_indices = @transform_12, window_bounds = array<i64: 32, 64>}, {pipeline_mode = #tpu.pipeline_mode<synchronous>, transform_indices = @transform_13, window_bounds = array<i64: 64, 32>}, {pipeline_mode = #tpu.pipeline_mode<synchronous>, transform_indices = @transform_14, window_bounds = array<i64: 16, 128>}, {transform_indices = @transform_15, window_bounds = array<i64: 16, 32>}]} {
    %c0 = arith.constant 0 : index
    %c0_0 = arith.constant 0 : index
    %0 = vector.load %arg15[%c0, %c0_0] : memref<16x128xf32, #tpu.memory_space<vmem>>, vector<16x128xf32>
    %1 = vector.extract_strided_slice %0 {offsets = [0, 0], sizes = [1, 4], strides = [1, 1]} : vector<16x128xf32> to vector<1x4xf32>
    %2 = vector.extract_strided_slice %0 {offsets = [1, 0], sizes = [1, 8], strides = [1, 1]} : vector<16x128xf32> to vector<1x8xf32>
    %3 = vector.extract_strided_slice %0 {offsets = [2, 0], sizes = [1, 16], strides = [1, 1]} : vector<16x128xf32> to vector<1x16xf32>
    %4 = vector.extract_strided_slice %0 {offsets = [3, 0], sizes = [1, 32], strides = [1, 1]} : vector<16x128xf32> to vector<1x32xf32>
    %5 = vector.extract_strided_slice %0 {offsets = [4, 0], sizes = [1, 32], strides = [1, 1]} : vector<16x128xf32> to vector<1x32xf32>
    %6 = vector.extract_strided_slice %0 {offsets = [5, 0], sizes = [1, 64], strides = [1, 1]} : vector<16x128xf32> to vector<1x64xf32>
    %7 = vector.extract_strided_slice %0 {offsets = [6, 0], sizes = [1, 32], strides = [1, 1]} : vector<16x128xf32> to vector<1x32xf32>
    %8 = vector.extract_strided_slice %0 {offsets = [7, 0], sizes = [1, 32], strides = [1, 1]} : vector<16x128xf32> to vector<1x32xf32>
    %9 = vector.extract_strided_slice %0 {offsets = [8, 0], sizes = [1, 32], strides = [1, 1]} : vector<16x128xf32> to vector<1x32xf32>
    %10 = vector.extract_strided_slice %0 {offsets = [9, 0], sizes = [1, 32], strides = [1, 1]} : vector<16x128xf32> to vector<1x32xf32>
    %11 = vector.extract_strided_slice %0 {offsets = [10, 0], sizes = [1, 96], strides = [1, 1]} : vector<16x128xf32> to vector<1x96xf32>
    %12 = vector.extract_strided_slice %0 {offsets = [11, 0], sizes = [1, 32], strides = [1, 1]} : vector<16x128xf32> to vector<1x32xf32>
    %13 = vector.extract_strided_slice %0 {offsets = [12, 0], sizes = [1, 64], strides = [1, 1]} : vector<16x128xf32> to vector<1x64xf32>
    %14 = vector.extract_strided_slice %0 {offsets = [13, 0], sizes = [1, 32], strides = [1, 1]} : vector<16x128xf32> to vector<1x32xf32>
    %15 = vector.extract_strided_slice %0 {offsets = [14, 0], sizes = [1, 32], strides = [1, 1]} : vector<16x128xf32> to vector<1x32xf32>
    %16 = vector.extract_strided_slice %0 {offsets = [15, 0], sizes = [1, 32], strides = [1, 1]} : vector<16x128xf32> to vector<1x32xf32>
    %c0_1 = arith.constant 0 : index
    %c0_2 = arith.constant 0 : index
    %17 = vector.load %arg1[%c0_1, %c0_2] : memref<16x32xf32, #tpu.memory_space<vmem>>, vector<16x32xf32>
    %c0_3 = arith.constant 0 : index
    %c0_4 = arith.constant 0 : index
    %18 = vector.load %arg2[%c0_3, %c0_4] : memref<32x3xf32, #tpu.memory_space<vmem>>, vector<32x3xf32>
    %19 = arith.truncf %18 : vector<32x3xf32> to vector<32x3xbf16>
    %c0_5 = arith.constant 0 : index
    %c0_6 = arith.constant 0 : index
    %20 = vector.load %arg3[%c0_5, %c0_6] : memref<3x4xbf16, #tpu.memory_space<vmem>>, vector<3x4xbf16>
    %cst = arith.constant dense<0.000000e+00> : vector<32x4xf32>
    %21 = tpu.matmul %19, %20, %cst {dimension_numbers = #tpu.dot_dimension_numbers<[1], [0], [0], [1], [0, 0, 1, 1], [], []>} : vector<32x3xbf16>, vector<3x4xbf16>, vector<32x4xf32> -> vector<32x4xf32>
    %22 = vector.broadcast %1 : vector<1x4xf32> to vector<32x4xf32>
    %23 = arith.addf %21, %22 : vector<32x4xf32>
    %cst_7 = arith.constant 0.000000e+00 : f32
    %24 = vector.broadcast %cst_7 : f32 to vector<32x4xf32>
    %25 = arith.maximumf %23, %24 : vector<32x4xf32>
    %26 = arith.truncf %25 : vector<32x4xf32> to vector<32x4xbf16>
    %c0_8 = arith.constant 0 : index
    %c0_9 = arith.constant 0 : index
    %27 = vector.load %arg4[%c0_8, %c0_9] : memref<4x8xbf16, #tpu.memory_space<vmem>>, vector<4x8xbf16>
    %cst_10 = arith.constant dense<0.000000e+00> : vector<32x8xf32>
    %28 = tpu.matmul %26, %27, %cst_10 {dimension_numbers = #tpu.dot_dimension_numbers<[1], [0], [0], [1], [0, 0, 1, 1], [], []>} : vector<32x4xbf16>, vector<4x8xbf16>, vector<32x8xf32> -> vector<32x8xf32>
    %29 = vector.broadcast %2 : vector<1x8xf32> to vector<32x8xf32>
    %30 = arith.addf %28, %29 : vector<32x8xf32>
    %cst_11 = arith.constant 0.000000e+00 : f32
    %31 = vector.broadcast %cst_11 : f32 to vector<32x8xf32>
    %32 = arith.maximumf %30, %31 : vector<32x8xf32>
    %33 = arith.truncf %32 : vector<32x8xf32> to vector<32x8xbf16>
    %c0_12 = arith.constant 0 : index
    %c0_13 = arith.constant 0 : index
    %34 = vector.load %arg5[%c0_12, %c0_13] : memref<8x16xbf16, #tpu.memory_space<vmem>>, vector<8x16xbf16>
    %cst_14 = arith.constant dense<0.000000e+00> : vector<32x16xf32>
    %35 = tpu.matmul %33, %34, %cst_14 {dimension_numbers = #tpu.dot_dimension_numbers<[1], [0], [0], [1], [0, 0, 1, 1], [], []>} : vector<32x8xbf16>, vector<8x16xbf16>, vector<32x16xf32> -> vector<32x16xf32>
    %36 = vector.broadcast %3 : vector<1x16xf32> to vector<32x16xf32>
    %37 = arith.addf %35, %36 : vector<32x16xf32>
    %cst_15 = arith.constant 0.000000e+00 : f32
    %38 = vector.broadcast %cst_15 : f32 to vector<32x16xf32>
    %39 = arith.maximumf %37, %38 : vector<32x16xf32>
    %40 = arith.truncf %39 : vector<32x16xf32> to vector<32x16xbf16>
    %c0_16 = arith.constant 0 : index
    %c0_17 = arith.constant 0 : index
    %41 = vector.load %arg6[%c0_16, %c0_17] : memref<16x32xbf16, #tpu.memory_space<vmem>>, vector<16x32xbf16>
    %cst_18 = arith.constant dense<0.000000e+00> : vector<32x32xf32>
    %42 = tpu.matmul %40, %41, %cst_18 {dimension_numbers = #tpu.dot_dimension_numbers<[1], [0], [0], [1], [0, 0, 1, 1], [], []>} : vector<32x16xbf16>, vector<16x32xbf16>, vector<32x32xf32> -> vector<32x32xf32>
    %43 = vector.broadcast %4 : vector<1x32xf32> to vector<32x32xf32>
    %44 = arith.addf %42, %43 : vector<32x32xf32>
    %45 = arith.truncf %44 : vector<32x32xf32> to vector<32x32xbf16>
    %46 = arith.truncf %17 : vector<16x32xf32> to vector<16x32xbf16>
    %c0_19 = arith.constant 0 : index
    %c0_20 = arith.constant 0 : index
    %47 = vector.load %arg7[%c0_19, %c0_20] : memref<32x32xbf16, #tpu.memory_space<vmem>>, vector<32x32xbf16>
    %cst_21 = arith.constant dense<0.000000e+00> : vector<16x32xf32>
    %48 = tpu.matmul %46, %47, %cst_21 {dimension_numbers = #tpu.dot_dimension_numbers<[1], [0], [0], [1], [0, 0, 1, 1], [], []>} : vector<16x32xbf16>, vector<32x32xbf16>, vector<16x32xf32> -> vector<16x32xf32>
    %49 = vector.broadcast %5 : vector<1x32xf32> to vector<16x32xf32>
    %50 = arith.addf %48, %49 : vector<16x32xf32>
    %51 = arith.truncf %50 : vector<16x32xf32> to vector<16x32xbf16>
    %c0_22 = arith.constant 0 : index
    %c0_23 = arith.constant 0 : index
    %52 = vector.load %arg8[%c0_22, %c0_23] : memref<32x64xbf16, #tpu.memory_space<vmem>>, vector<32x64xbf16>
    %cst_24 = arith.constant dense<0.000000e+00> : vector<32x64xf32>
    %53 = tpu.matmul %45, %52, %cst_24 {dimension_numbers = #tpu.dot_dimension_numbers<[1], [0], [0], [1], [0, 0, 1, 1], [], []>} : vector<32x32xbf16>, vector<32x64xbf16>, vector<32x64xf32> -> vector<32x64xf32>
    %54 = vector.broadcast %6 : vector<1x64xf32> to vector<32x64xf32>
    %55 = arith.addf %53, %54 : vector<32x64xf32>
    %56 = arith.truncf %55 : vector<32x64xf32> to vector<32x64xbf16>
    %57 = vector.extract_strided_slice %51 {offsets = [0, 0], sizes = [8, 32], strides = [1, 1]} : vector<16x32xbf16> to vector<8x32xbf16>
    %58 = vector.extract_strided_slice %56 {offsets = [0, 0], sizes = [16, 64], strides = [1, 1]} : vector<32x64xbf16> to vector<16x64xbf16>
    %59 = vector.extract_strided_slice %57 {offsets = [0, 0], sizes = [8, 8], strides = [1, 1]} : vector<8x32xbf16> to vector<8x8xbf16>
    %60 = vector.extract_strided_slice %58 {offsets = [0, 0], sizes = [16, 8], strides = [1, 1]} : vector<16x64xbf16> to vector<16x8xbf16>
    %61 = vector.extract_strided_slice %58 {offsets = [0, 32], sizes = [16, 8], strides = [1, 1]} : vector<16x64xbf16> to vector<16x8xbf16>
    %cst_25 = arith.constant dense<0.000000e+00> : vector<8x16xf32>
    %62 = tpu.matmul %59, %60, %cst_25 {dimension_numbers = #tpu.dot_dimension_numbers<[1], [1], [0], [0], [0, 0, 1, 0], [], []>} : vector<8x8xbf16>, vector<16x8xbf16>, vector<8x16xf32> -> vector<8x16xf32>
    %cst_26 = arith.constant dense<0xFF800000> : vector<8xf32>
    %63 = vector.multi_reduction <maximumf>, %62, %cst_26 [1] : vector<8x16xf32> to vector<8xf32>
    %64 = vector.shape_cast %63 : vector<8xf32> to vector<8x1xf32>
    %65 = vector.broadcast %64 : vector<8x1xf32> to vector<8x16xf32>
    %66 = arith.subf %62, %65 : vector<8x16xf32>
    %67 = math.exp %66 : vector<8x16xf32>
    %cst_27 = arith.constant dense<0.000000e+00> : vector<8xf32>
    %68 = vector.multi_reduction <add>, %67, %cst_27 [1] : vector<8x16xf32> to vector<8xf32>
    %69 = vector.shape_cast %68 : vector<8xf32> to vector<8x1xf32>
    %70 = tpu.reciprocal %69 {approx = true} : vector<8x1xf32> -> vector<8x1xf32>
    %71 = vector.broadcast %70 : vector<8x1xf32> to vector<8x16xf32>
    %72 = arith.mulf %67, %71 : vector<8x16xf32>
    %73 = arith.truncf %72 : vector<8x16xf32> to vector<8x16xbf16>
    %cst_28 = arith.constant dense<0.000000e+00> : vector<8x8xf32>
    %74 = tpu.matmul %73, %61, %cst_28 {dimension_numbers = #tpu.dot_dimension_numbers<[1], [0], [0], [1], [0, 0, 1, 1], [], []>} : vector<8x16xbf16>, vector<16x8xbf16>, vector<8x8xf32> -> vector<8x8xf32>
    %75 = vector.extract_strided_slice %57 {offsets = [0, 8], sizes = [8, 8], strides = [1, 1]} : vector<8x32xbf16> to vector<8x8xbf16>
    %76 = vector.extract_strided_slice %58 {offsets = [0, 8], sizes = [16, 8], strides = [1, 1]} : vector<16x64xbf16> to vector<16x8xbf16>
    %77 = vector.extract_strided_slice %58 {offsets = [0, 40], sizes = [16, 8], strides = [1, 1]} : vector<16x64xbf16> to vector<16x8xbf16>
    %cst_29 = arith.constant dense<0.000000e+00> : vector<8x16xf32>
    %78 = tpu.matmul %75, %76, %cst_29 {dimension_numbers = #tpu.dot_dimension_numbers<[1], [1], [0], [0], [0, 0, 1, 0], [], []>} : vector<8x8xbf16>, vector<16x8xbf16>, vector<8x16xf32> -> vector<8x16xf32>
    %cst_30 = arith.constant dense<0xFF800000> : vector<8xf32>
    %79 = vector.multi_reduction <maximumf>, %78, %cst_30 [1] : vector<8x16xf32> to vector<8xf32>
    %80 = vector.shape_cast %79 : vector<8xf32> to vector<8x1xf32>
    %81 = vector.broadcast %80 : vector<8x1xf32> to vector<8x16xf32>
    %82 = arith.subf %78, %81 : vector<8x16xf32>
    %83 = math.exp %82 : vector<8x16xf32>
    %cst_31 = arith.constant dense<0.000000e+00> : vector<8xf32>
    %84 = vector.multi_reduction <add>, %83, %cst_31 [1] : vector<8x16xf32> to vector<8xf32>
    %85 = vector.shape_cast %84 : vector<8xf32> to vector<8x1xf32>
    %86 = tpu.reciprocal %85 {approx = true} : vector<8x1xf32> -> vector<8x1xf32>
    %87 = vector.broadcast %86 : vector<8x1xf32> to vector<8x16xf32>
    %88 = arith.mulf %83, %87 : vector<8x16xf32>
    %89 = arith.truncf %88 : vector<8x16xf32> to vector<8x16xbf16>
    %cst_32 = arith.constant dense<0.000000e+00> : vector<8x8xf32>
    %90 = tpu.matmul %89, %77, %cst_32 {dimension_numbers = #tpu.dot_dimension_numbers<[1], [0], [0], [1], [0, 0, 1, 1], [], []>} : vector<8x16xbf16>, vector<16x8xbf16>, vector<8x8xf32> -> vector<8x8xf32>
    %91 = vector.extract_strided_slice %57 {offsets = [0, 16], sizes = [8, 8], strides = [1, 1]} : vector<8x32xbf16> to vector<8x8xbf16>
    %92 = vector.extract_strided_slice %58 {offsets = [0, 16], sizes = [16, 8], strides = [1, 1]} : vector<16x64xbf16> to vector<16x8xbf16>
    %93 = vector.extract_strided_slice %58 {offsets = [0, 48], sizes = [16, 8], strides = [1, 1]} : vector<16x64xbf16> to vector<16x8xbf16>
    %cst_33 = arith.constant dense<0.000000e+00> : vector<8x16xf32>
    %94 = tpu.matmul %91, %92, %cst_33 {dimension_numbers = #tpu.dot_dimension_numbers<[1], [1], [0], [0], [0, 0, 1, 0], [], []>} : vector<8x8xbf16>, vector<16x8xbf16>, vector<8x16xf32> -> vector<8x16xf32>
    %cst_34 = arith.constant dense<0xFF800000> : vector<8xf32>
    %95 = vector.multi_reduction <maximumf>, %94, %cst_34 [1] : vector<8x16xf32> to vector<8xf32>
    %96 = vector.shape_cast %95 : vector<8xf32> to vector<8x1xf32>
    %97 = vector.broadcast %96 : vector<8x1xf32> to vector<8x16xf32>
    %98 = arith.subf %94, %97 : vector<8x16xf32>
    %99 = math.exp %98 : vector<8x16xf32>
    %cst_35 = arith.constant dense<0.000000e+00> : vector<8xf32>
    %100 = vector.multi_reduction <add>, %99, %cst_35 [1] : vector<8x16xf32> to vector<8xf32>
    %101 = vector.shape_cast %100 : vector<8xf32> to vector<8x1xf32>
    %102 = tpu.reciprocal %101 {approx = true} : vector<8x1xf32> -> vector<8x1xf32>
    %103 = vector.broadcast %102 : vector<8x1xf32> to vector<8x16xf32>
    %104 = arith.mulf %99, %103 : vector<8x16xf32>
    %105 = arith.truncf %104 : vector<8x16xf32> to vector<8x16xbf16>
    %cst_36 = arith.constant dense<0.000000e+00> : vector<8x8xf32>
    %106 = tpu.matmul %105, %93, %cst_36 {dimension_numbers = #tpu.dot_dimension_numbers<[1], [0], [0], [1], [0, 0, 1, 1], [], []>} : vector<8x16xbf16>, vector<16x8xbf16>, vector<8x8xf32> -> vector<8x8xf32>
    %107 = vector.extract_strided_slice %57 {offsets = [0, 24], sizes = [8, 8], strides = [1, 1]} : vector<8x32xbf16> to vector<8x8xbf16>
    %108 = vector.extract_strided_slice %58 {offsets = [0, 24], sizes = [16, 8], strides = [1, 1]} : vector<16x64xbf16> to vector<16x8xbf16>
    %109 = vector.extract_strided_slice %58 {offsets = [0, 56], sizes = [16, 8], strides = [1, 1]} : vector<16x64xbf16> to vector<16x8xbf16>
    %cst_37 = arith.constant dense<0.000000e+00> : vector<8x16xf32>
    %110 = tpu.matmul %107, %108, %cst_37 {dimension_numbers = #tpu.dot_dimension_numbers<[1], [1], [0], [0], [0, 0, 1, 0], [], []>} : vector<8x8xbf16>, vector<16x8xbf16>, vector<8x16xf32> -> vector<8x16xf32>
    %cst_38 = arith.constant dense<0xFF800000> : vector<8xf32>
    %111 = vector.multi_reduction <maximumf>, %110, %cst_38 [1] : vector<8x16xf32> to vector<8xf32>
    %112 = vector.shape_cast %111 : vector<8xf32> to vector<8x1xf32>
    %113 = vector.broadcast %112 : vector<8x1xf32> to vector<8x16xf32>
    %114 = arith.subf %110, %113 : vector<8x16xf32>
    %115 = math.exp %114 : vector<8x16xf32>
    %cst_39 = arith.constant dense<0.000000e+00> : vector<8xf32>
    %116 = vector.multi_reduction <add>, %115, %cst_39 [1] : vector<8x16xf32> to vector<8xf32>
    %117 = vector.shape_cast %116 : vector<8xf32> to vector<8x1xf32>
    %118 = tpu.reciprocal %117 {approx = true} : vector<8x1xf32> -> vector<8x1xf32>
    %119 = vector.broadcast %118 : vector<8x1xf32> to vector<8x16xf32>
    %120 = arith.mulf %115, %119 : vector<8x16xf32>
    %121 = arith.truncf %120 : vector<8x16xf32> to vector<8x16xbf16>
    %cst_40 = arith.constant dense<0.000000e+00> : vector<8x8xf32>
    %122 = tpu.matmul %121, %109, %cst_40 {dimension_numbers = #tpu.dot_dimension_numbers<[1], [0], [0], [1], [0, 0, 1, 1], [], []>} : vector<8x16xbf16>, vector<16x8xbf16>, vector<8x8xf32> -> vector<8x8xf32>
    %123 = tpu.concatenate %74, %90, %106, %122 in 1 : vector<8x8xf32>, vector<8x8xf32>, vector<8x8xf32>, vector<8x8xf32> -> vector<8x32xf32>
    %124 = vector.extract_strided_slice %51 {offsets = [8, 0], sizes = [8, 32], strides = [1, 1]} : vector<16x32xbf16> to vector<8x32xbf16>
    %125 = vector.extract_strided_slice %56 {offsets = [16, 0], sizes = [16, 64], strides = [1, 1]} : vector<32x64xbf16> to vector<16x64xbf16>
    %126 = vector.extract_strided_slice %124 {offsets = [0, 0], sizes = [8, 8], strides = [1, 1]} : vector<8x32xbf16> to vector<8x8xbf16>
    %127 = vector.extract_strided_slice %125 {offsets = [0, 0], sizes = [16, 8], strides = [1, 1]} : vector<16x64xbf16> to vector<16x8xbf16>
    %128 = vector.extract_strided_slice %125 {offsets = [0, 32], sizes = [16, 8], strides = [1, 1]} : vector<16x64xbf16> to vector<16x8xbf16>
    %cst_41 = arith.constant dense<0.000000e+00> : vector<8x16xf32>
    %129 = tpu.matmul %126, %127, %cst_41 {dimension_numbers = #tpu.dot_dimension_numbers<[1], [1], [0], [0], [0, 0, 1, 0], [], []>} : vector<8x8xbf16>, vector<16x8xbf16>, vector<8x16xf32> -> vector<8x16xf32>
    %cst_42 = arith.constant dense<0xFF800000> : vector<8xf32>
    %130 = vector.multi_reduction <maximumf>, %129, %cst_42 [1] : vector<8x16xf32> to vector<8xf32>
    %131 = vector.shape_cast %130 : vector<8xf32> to vector<8x1xf32>
    %132 = vector.broadcast %131 : vector<8x1xf32> to vector<8x16xf32>
    %133 = arith.subf %129, %132 : vector<8x16xf32>
    %134 = math.exp %133 : vector<8x16xf32>
    %cst_43 = arith.constant dense<0.000000e+00> : vector<8xf32>
    %135 = vector.multi_reduction <add>, %134, %cst_43 [1] : vector<8x16xf32> to vector<8xf32>
    %136 = vector.shape_cast %135 : vector<8xf32> to vector<8x1xf32>
    %137 = tpu.reciprocal %136 {approx = true} : vector<8x1xf32> -> vector<8x1xf32>
    %138 = vector.broadcast %137 : vector<8x1xf32> to vector<8x16xf32>
    %139 = arith.mulf %134, %138 : vector<8x16xf32>
    %140 = arith.truncf %139 : vector<8x16xf32> to vector<8x16xbf16>
    %cst_44 = arith.constant dense<0.000000e+00> : vector<8x8xf32>
    %141 = tpu.matmul %140, %128, %cst_44 {dimension_numbers = #tpu.dot_dimension_numbers<[1], [0], [0], [1], [0, 0, 1, 1], [], []>} : vector<8x16xbf16>, vector<16x8xbf16>, vector<8x8xf32> -> vector<8x8xf32>
    %142 = vector.extract_strided_slice %124 {offsets = [0, 8], sizes = [8, 8], strides = [1, 1]} : vector<8x32xbf16> to vector<8x8xbf16>
    %143 = vector.extract_strided_slice %125 {offsets = [0, 8], sizes = [16, 8], strides = [1, 1]} : vector<16x64xbf16> to vector<16x8xbf16>
    %144 = vector.extract_strided_slice %125 {offsets = [0, 40], sizes = [16, 8], strides = [1, 1]} : vector<16x64xbf16> to vector<16x8xbf16>
    %cst_45 = arith.constant dense<0.000000e+00> : vector<8x16xf32>
    %145 = tpu.matmul %142, %143, %cst_45 {dimension_numbers = #tpu.dot_dimension_numbers<[1], [1], [0], [0], [0, 0, 1, 0], [], []>} : vector<8x8xbf16>, vector<16x8xbf16>, vector<8x16xf32> -> vector<8x16xf32>
    %cst_46 = arith.constant dense<0xFF800000> : vector<8xf32>
    %146 = vector.multi_reduction <maximumf>, %145, %cst_46 [1] : vector<8x16xf32> to vector<8xf32>
    %147 = vector.shape_cast %146 : vector<8xf32> to vector<8x1xf32>
    %148 = vector.broadcast %147 : vector<8x1xf32> to vector<8x16xf32>
    %149 = arith.subf %145, %148 : vector<8x16xf32>
    %150 = math.exp %149 : vector<8x16xf32>
    %cst_47 = arith.constant dense<0.000000e+00> : vector<8xf32>
    %151 = vector.multi_reduction <add>, %150, %cst_47 [1] : vector<8x16xf32> to vector<8xf32>
    %152 = vector.shape_cast %151 : vector<8xf32> to vector<8x1xf32>
    %153 = tpu.reciprocal %152 {approx = true} : vector<8x1xf32> -> vector<8x1xf32>
    %154 = vector.broadcast %153 : vector<8x1xf32> to vector<8x16xf32>
    %155 = arith.mulf %150, %154 : vector<8x16xf32>
    %156 = arith.truncf %155 : vector<8x16xf32> to vector<8x16xbf16>
    %cst_48 = arith.constant dense<0.000000e+00> : vector<8x8xf32>
    %157 = tpu.matmul %156, %144, %cst_48 {dimension_numbers = #tpu.dot_dimension_numbers<[1], [0], [0], [1], [0, 0, 1, 1], [], []>} : vector<8x16xbf16>, vector<16x8xbf16>, vector<8x8xf32> -> vector<8x8xf32>
    %158 = vector.extract_strided_slice %124 {offsets = [0, 16], sizes = [8, 8], strides = [1, 1]} : vector<8x32xbf16> to vector<8x8xbf16>
    %159 = vector.extract_strided_slice %125 {offsets = [0, 16], sizes = [16, 8], strides = [1, 1]} : vector<16x64xbf16> to vector<16x8xbf16>
    %160 = vector.extract_strided_slice %125 {offsets = [0, 48], sizes = [16, 8], strides = [1, 1]} : vector<16x64xbf16> to vector<16x8xbf16>
    %cst_49 = arith.constant dense<0.000000e+00> : vector<8x16xf32>
    %161 = tpu.matmul %158, %159, %cst_49 {dimension_numbers = #tpu.dot_dimension_numbers<[1], [1], [0], [0], [0, 0, 1, 0], [], []>} : vector<8x8xbf16>, vector<16x8xbf16>, vector<8x16xf32> -> vector<8x16xf32>
    %cst_50 = arith.constant dense<0xFF800000> : vector<8xf32>
    %162 = vector.multi_reduction <maximumf>, %161, %cst_50 [1] : vector<8x16xf32> to vector<8xf32>
    %163 = vector.shape_cast %162 : vector<8xf32> to vector<8x1xf32>
    %164 = vector.broadcast %163 : vector<8x1xf32> to vector<8x16xf32>
    %165 = arith.subf %161, %164 : vector<8x16xf32>
    %166 = math.exp %165 : vector<8x16xf32>
    %cst_51 = arith.constant dense<0.000000e+00> : vector<8xf32>
    %167 = vector.multi_reduction <add>, %166, %cst_51 [1] : vector<8x16xf32> to vector<8xf32>
    %168 = vector.shape_cast %167 : vector<8xf32> to vector<8x1xf32>
    %169 = tpu.reciprocal %168 {approx = true} : vector<8x1xf32> -> vector<8x1xf32>
    %170 = vector.broadcast %169 : vector<8x1xf32> to vector<8x16xf32>
    %171 = arith.mulf %166, %170 : vector<8x16xf32>
    %172 = arith.truncf %171 : vector<8x16xf32> to vector<8x16xbf16>
    %cst_52 = arith.constant dense<0.000000e+00> : vector<8x8xf32>
    %173 = tpu.matmul %172, %160, %cst_52 {dimension_numbers = #tpu.dot_dimension_numbers<[1], [0], [0], [1], [0, 0, 1, 1], [], []>} : vector<8x16xbf16>, vector<16x8xbf16>, vector<8x8xf32> -> vector<8x8xf32>
    %174 = vector.extract_strided_slice %124 {offsets = [0, 24], sizes = [8, 8], strides = [1, 1]} : vector<8x32xbf16> to vector<8x8xbf16>
    %175 = vector.extract_strided_slice %125 {offsets = [0, 24], sizes = [16, 8], strides = [1, 1]} : vector<16x64xbf16> to vector<16x8xbf16>
    %176 = vector.extract_strided_slice %125 {offsets = [0, 56], sizes = [16, 8], strides = [1, 1]} : vector<16x64xbf16> to vector<16x8xbf16>
    %cst_53 = arith.constant dense<0.000000e+00> : vector<8x16xf32>
    %177 = tpu.matmul %174, %175, %cst_53 {dimension_numbers = #tpu.dot_dimension_numbers<[1], [1], [0], [0], [0, 0, 1, 0], [], []>} : vector<8x8xbf16>, vector<16x8xbf16>, vector<8x16xf32> -> vector<8x16xf32>
    %cst_54 = arith.constant dense<0xFF800000> : vector<8xf32>
    %178 = vector.multi_reduction <maximumf>, %177, %cst_54 [1] : vector<8x16xf32> to vector<8xf32>
    %179 = vector.shape_cast %178 : vector<8xf32> to vector<8x1xf32>
    %180 = vector.broadcast %179 : vector<8x1xf32> to vector<8x16xf32>
    %181 = arith.subf %177, %180 : vector<8x16xf32>
    %182 = math.exp %181 : vector<8x16xf32>
    %cst_55 = arith.constant dense<0.000000e+00> : vector<8xf32>
    %183 = vector.multi_reduction <add>, %182, %cst_55 [1] : vector<8x16xf32> to vector<8xf32>
    %184 = vector.shape_cast %183 : vector<8xf32> to vector<8x1xf32>
    %185 = tpu.reciprocal %184 {approx = true} : vector<8x1xf32> -> vector<8x1xf32>
    %186 = vector.broadcast %185 : vector<8x1xf32> to vector<8x16xf32>
    %187 = arith.mulf %182, %186 : vector<8x16xf32>
    %188 = arith.truncf %187 : vector<8x16xf32> to vector<8x16xbf16>
    %cst_56 = arith.constant dense<0.000000e+00> : vector<8x8xf32>
    %189 = tpu.matmul %188, %176, %cst_56 {dimension_numbers = #tpu.dot_dimension_numbers<[1], [0], [0], [1], [0, 0, 1, 1], [], []>} : vector<8x16xbf16>, vector<16x8xbf16>, vector<8x8xf32> -> vector<8x8xf32>
    %190 = tpu.concatenate %141, %157, %173, %189 in 1 : vector<8x8xf32>, vector<8x8xf32>, vector<8x8xf32>, vector<8x8xf32> -> vector<8x32xf32>
    %191 = tpu.concatenate %123, %190 in 0 : vector<8x32xf32>, vector<8x32xf32> -> vector<16x32xf32>
    %192 = arith.truncf %191 : vector<16x32xf32> to vector<16x32xbf16>
    %c0_57 = arith.constant 0 : index
    %c0_58 = arith.constant 0 : index
    %193 = vector.load %arg9[%c0_57, %c0_58] : memref<32x32xbf16, #tpu.memory_space<vmem>>, vector<32x32xbf16>
    %cst_59 = arith.constant dense<0.000000e+00> : vector<16x32xf32>
    %194 = tpu.matmul %192, %193, %cst_59 {dimension_numbers = #tpu.dot_dimension_numbers<[1], [0], [0], [1], [0, 0, 1, 1], [], []>} : vector<16x32xbf16>, vector<32x32xbf16>, vector<16x32xf32> -> vector<16x32xf32>
    %195 = vector.broadcast %7 : vector<1x32xf32> to vector<16x32xf32>
    %196 = arith.addf %194, %195 : vector<16x32xf32>
    %197 = arith.truncf %196 : vector<16x32xf32> to vector<16x32xbf16>
    %c0_60 = arith.constant 0 : index
    %c0_61 = arith.constant 0 : index
    %198 = vector.load %arg10[%c0_60, %c0_61] : memref<32x32xbf16, #tpu.memory_space<vmem>>, vector<32x32xbf16>
    %cst_62 = arith.constant dense<0.000000e+00> : vector<16x32xf32>
    %199 = tpu.matmul %197, %198, %cst_62 {dimension_numbers = #tpu.dot_dimension_numbers<[1], [0], [0], [1], [0, 0, 1, 1], [], []>} : vector<16x32xbf16>, vector<32x32xbf16>, vector<16x32xf32> -> vector<16x32xf32>
    %200 = arith.addf %17, %199 : vector<16x32xf32>
    %201 = vector.broadcast %8 : vector<1x32xf32> to vector<16x32xf32>
    %202 = arith.addf %200, %201 : vector<16x32xf32>
    %cst_63 = arith.constant dense<0.000000e+00> : vector<16xf32>
    %203 = vector.multi_reduction <add>, %202, %cst_63 [1] : vector<16x32xf32> to vector<16xf32>
    %204 = vector.shape_cast %203 : vector<16xf32> to vector<16x1xf32>
    %cst_64 = arith.constant 3.200000e+01 : f32
    %205 = vector.broadcast %cst_64 : f32 to vector<16x1xf32>
    %206 = arith.divf %204, %205 : vector<16x1xf32>
    %207 = vector.broadcast %206 : vector<16x1xf32> to vector<16x32xf32>
    %208 = arith.subf %202, %207 : vector<16x32xf32>
    %209 = arith.mulf %208, %208 : vector<16x32xf32>
    %cst_65 = arith.constant dense<0.000000e+00> : vector<16xf32>
    %210 = vector.multi_reduction <add>, %209, %cst_65 [1] : vector<16x32xf32> to vector<16xf32>
    %211 = vector.shape_cast %210 : vector<16xf32> to vector<16x1xf32>
    %cst_66 = arith.constant 3.200000e+01 : f32
    %212 = vector.broadcast %cst_66 : f32 to vector<16x1xf32>
    %213 = arith.divf %211, %212 : vector<16x1xf32>
    %214 = vector.broadcast %206 : vector<16x1xf32> to vector<16x32xf32>
    %215 = arith.subf %202, %214 : vector<16x32xf32>
    %cst_67 = arith.constant 9.99999974E-6 : f32
    %216 = vector.broadcast %cst_67 : f32 to vector<16x1xf32>
    %217 = arith.addf %213, %216 : vector<16x1xf32>
    %218 = math.rsqrt %217 : vector<16x1xf32>
    %219 = vector.broadcast %218 : vector<16x1xf32> to vector<16x32xf32>
    %220 = arith.mulf %215, %219 : vector<16x32xf32>
    %221 = vector.broadcast %9 : vector<1x32xf32> to vector<16x32xf32>
    %222 = arith.mulf %220, %221 : vector<16x32xf32>
    %223 = vector.broadcast %10 : vector<1x32xf32> to vector<16x32xf32>
    %224 = arith.addf %222, %223 : vector<16x32xf32>
    %225 = arith.truncf %224 : vector<16x32xf32> to vector<16x32xbf16>
    %c0_68 = arith.constant 0 : index
    %c0_69 = arith.constant 0 : index
    %226 = vector.load %arg11[%c0_68, %c0_69] : memref<32x96xbf16, #tpu.memory_space<vmem>>, vector<32x96xbf16>
    %cst_70 = arith.constant dense<0.000000e+00> : vector<16x96xf32>
    %227 = tpu.matmul %225, %226, %cst_70 {dimension_numbers = #tpu.dot_dimension_numbers<[1], [0], [0], [1], [0, 0, 1, 1], [], []>} : vector<16x32xbf16>, vector<32x96xbf16>, vector<16x96xf32> -> vector<16x96xf32>
    %228 = vector.broadcast %11 : vector<1x96xf32> to vector<16x96xf32>
    %229 = arith.addf %227, %228 : vector<16x96xf32>
    %230 = arith.truncf %229 : vector<16x96xf32> to vector<16x96xbf16>
    %231 = vector.extract_strided_slice %230 {offsets = [0, 0], sizes = [8, 96], strides = [1, 1]} : vector<16x96xbf16> to vector<8x96xbf16>
    %232 = vector.extract_strided_slice %230 {offsets = [0, 0], sizes = [8, 96], strides = [1, 1]} : vector<16x96xbf16> to vector<8x96xbf16>
    %233 = vector.extract_strided_slice %231 {offsets = [0, 0], sizes = [8, 8], strides = [1, 1]} : vector<8x96xbf16> to vector<8x8xbf16>
    %234 = vector.extract_strided_slice %232 {offsets = [0, 32], sizes = [8, 8], strides = [1, 1]} : vector<8x96xbf16> to vector<8x8xbf16>
    %235 = vector.extract_strided_slice %232 {offsets = [0, 64], sizes = [8, 8], strides = [1, 1]} : vector<8x96xbf16> to vector<8x8xbf16>
    %cst_71 = arith.constant dense<0.000000e+00> : vector<8x8xf32>
    %236 = tpu.matmul %233, %234, %cst_71 {dimension_numbers = #tpu.dot_dimension_numbers<[1], [1], [0], [0], [0, 0, 1, 0], [], []>} : vector<8x8xbf16>, vector<8x8xbf16>, vector<8x8xf32> -> vector<8x8xf32>
    %cst_72 = arith.constant dense<0xFF800000> : vector<8xf32>
    %237 = vector.multi_reduction <maximumf>, %236, %cst_72 [1] : vector<8x8xf32> to vector<8xf32>
    %238 = vector.shape_cast %237 : vector<8xf32> to vector<8x1xf32>
    %239 = vector.broadcast %238 : vector<8x1xf32> to vector<8x8xf32>
    %240 = arith.subf %236, %239 : vector<8x8xf32>
    %241 = math.exp %240 : vector<8x8xf32>
    %cst_73 = arith.constant dense<0.000000e+00> : vector<8xf32>
    %242 = vector.multi_reduction <add>, %241, %cst_73 [1] : vector<8x8xf32> to vector<8xf32>
    %243 = vector.shape_cast %242 : vector<8xf32> to vector<8x1xf32>
    %244 = tpu.reciprocal %243 {approx = true} : vector<8x1xf32> -> vector<8x1xf32>
    %245 = vector.broadcast %244 : vector<8x1xf32> to vector<8x8xf32>
    %246 = arith.mulf %241, %245 : vector<8x8xf32>
    %247 = arith.truncf %246 : vector<8x8xf32> to vector<8x8xbf16>
    %cst_74 = arith.constant dense<0.000000e+00> : vector<8x8xf32>
    %248 = tpu.matmul %247, %235, %cst_74 {dimension_numbers = #tpu.dot_dimension_numbers<[1], [0], [0], [1], [0, 0, 1, 1], [], []>} : vector<8x8xbf16>, vector<8x8xbf16>, vector<8x8xf32> -> vector<8x8xf32>
    %249 = vector.extract_strided_slice %231 {offsets = [0, 8], sizes = [8, 8], strides = [1, 1]} : vector<8x96xbf16> to vector<8x8xbf16>
    %250 = vector.extract_strided_slice %232 {offsets = [0, 40], sizes = [8, 8], strides = [1, 1]} : vector<8x96xbf16> to vector<8x8xbf16>
    %251 = vector.extract_strided_slice %232 {offsets = [0, 72], sizes = [8, 8], strides = [1, 1]} : vector<8x96xbf16> to vector<8x8xbf16>
    %cst_75 = arith.constant dense<0.000000e+00> : vector<8x8xf32>
    %252 = tpu.matmul %249, %250, %cst_75 {dimension_numbers = #tpu.dot_dimension_numbers<[1], [1], [0], [0], [0, 0, 1, 0], [], []>} : vector<8x8xbf16>, vector<8x8xbf16>, vector<8x8xf32> -> vector<8x8xf32>
    %cst_76 = arith.constant dense<0xFF800000> : vector<8xf32>
    %253 = vector.multi_reduction <maximumf>, %252, %cst_76 [1] : vector<8x8xf32> to vector<8xf32>
    %254 = vector.shape_cast %253 : vector<8xf32> to vector<8x1xf32>
    %255 = vector.broadcast %254 : vector<8x1xf32> to vector<8x8xf32>
    %256 = arith.subf %252, %255 : vector<8x8xf32>
    %257 = math.exp %256 : vector<8x8xf32>
    %cst_77 = arith.constant dense<0.000000e+00> : vector<8xf32>
    %258 = vector.multi_reduction <add>, %257, %cst_77 [1] : vector<8x8xf32> to vector<8xf32>
    %259 = vector.shape_cast %258 : vector<8xf32> to vector<8x1xf32>
    %260 = tpu.reciprocal %259 {approx = true} : vector<8x1xf32> -> vector<8x1xf32>
    %261 = vector.broadcast %260 : vector<8x1xf32> to vector<8x8xf32>
    %262 = arith.mulf %257, %261 : vector<8x8xf32>
    %263 = arith.truncf %262 : vector<8x8xf32> to vector<8x8xbf16>
    %cst_78 = arith.constant dense<0.000000e+00> : vector<8x8xf32>
    %264 = tpu.matmul %263, %251, %cst_78 {dimension_numbers = #tpu.dot_dimension_numbers<[1], [0], [0], [1], [0, 0, 1, 1], [], []>} : vector<8x8xbf16>, vector<8x8xbf16>, vector<8x8xf32> -> vector<8x8xf32>
    %265 = vector.extract_strided_slice %231 {offsets = [0, 16], sizes = [8, 8], strides = [1, 1]} : vector<8x96xbf16> to vector<8x8xbf16>
    %266 = vector.extract_strided_slice %232 {offsets = [0, 48], sizes = [8, 8], strides = [1, 1]} : vector<8x96xbf16> to vector<8x8xbf16>
    %267 = vector.extract_strided_slice %232 {offsets = [0, 80], sizes = [8, 8], strides = [1, 1]} : vector<8x96xbf16> to vector<8x8xbf16>
    %cst_79 = arith.constant dense<0.000000e+00> : vector<8x8xf32>
    %268 = tpu.matmul %265, %266, %cst_79 {dimension_numbers = #tpu.dot_dimension_numbers<[1], [1], [0], [0], [0, 0, 1, 0], [], []>} : vector<8x8xbf16>, vector<8x8xbf16>, vector<8x8xf32> -> vector<8x8xf32>
    %cst_80 = arith.constant dense<0xFF800000> : vector<8xf32>
    %269 = vector.multi_reduction <maximumf>, %268, %cst_80 [1] : vector<8x8xf32> to vector<8xf32>
    %270 = vector.shape_cast %269 : vector<8xf32> to vector<8x1xf32>
    %271 = vector.broadcast %270 : vector<8x1xf32> to vector<8x8xf32>
    %272 = arith.subf %268, %271 : vector<8x8xf32>
    %273 = math.exp %272 : vector<8x8xf32>
    %cst_81 = arith.constant dense<0.000000e+00> : vector<8xf32>
    %274 = vector.multi_reduction <add>, %273, %cst_81 [1] : vector<8x8xf32> to vector<8xf32>
    %275 = vector.shape_cast %274 : vector<8xf32> to vector<8x1xf32>
    %276 = tpu.reciprocal %275 {approx = true} : vector<8x1xf32> -> vector<8x1xf32>
    %277 = vector.broadcast %276 : vector<8x1xf32> to vector<8x8xf32>
    %278 = arith.mulf %273, %277 : vector<8x8xf32>
    %279 = arith.truncf %278 : vector<8x8xf32> to vector<8x8xbf16>
    %cst_82 = arith.constant dense<0.000000e+00> : vector<8x8xf32>
    %280 = tpu.matmul %279, %267, %cst_82 {dimension_numbers = #tpu.dot_dimension_numbers<[1], [0], [0], [1], [0, 0, 1, 1], [], []>} : vector<8x8xbf16>, vector<8x8xbf16>, vector<8x8xf32> -> vector<8x8xf32>
    %281 = vector.extract_strided_slice %231 {offsets = [0, 24], sizes = [8, 8], strides = [1, 1]} : vector<8x96xbf16> to vector<8x8xbf16>
    %282 = vector.extract_strided_slice %232 {offsets = [0, 56], sizes = [8, 8], strides = [1, 1]} : vector<8x96xbf16> to vector<8x8xbf16>
    %283 = vector.extract_strided_slice %232 {offsets = [0, 88], sizes = [8, 8], strides = [1, 1]} : vector<8x96xbf16> to vector<8x8xbf16>
    %cst_83 = arith.constant dense<0.000000e+00> : vector<8x8xf32>
    %284 = tpu.matmul %281, %282, %cst_83 {dimension_numbers = #tpu.dot_dimension_numbers<[1], [1], [0], [0], [0, 0, 1, 0], [], []>} : vector<8x8xbf16>, vector<8x8xbf16>, vector<8x8xf32> -> vector<8x8xf32>
    %cst_84 = arith.constant dense<0xFF800000> : vector<8xf32>
    %285 = vector.multi_reduction <maximumf>, %284, %cst_84 [1] : vector<8x8xf32> to vector<8xf32>
    %286 = vector.shape_cast %285 : vector<8xf32> to vector<8x1xf32>
    %287 = vector.broadcast %286 : vector<8x1xf32> to vector<8x8xf32>
    %288 = arith.subf %284, %287 : vector<8x8xf32>
    %289 = math.exp %288 : vector<8x8xf32>
    %cst_85 = arith.constant dense<0.000000e+00> : vector<8xf32>
    %290 = vector.multi_reduction <add>, %289, %cst_85 [1] : vector<8x8xf32> to vector<8xf32>
    %291 = vector.shape_cast %290 : vector<8xf32> to vector<8x1xf32>
    %292 = tpu.reciprocal %291 {approx = true} : vector<8x1xf32> -> vector<8x1xf32>
    %293 = vector.broadcast %292 : vector<8x1xf32> to vector<8x8xf32>
    %294 = arith.mulf %289, %293 : vector<8x8xf32>
    %295 = arith.truncf %294 : vector<8x8xf32> to vector<8x8xbf16>
    %cst_86 = arith.constant dense<0.000000e+00> : vector<8x8xf32>
    %296 = tpu.matmul %295, %283, %cst_86 {dimension_numbers = #tpu.dot_dimension_numbers<[1], [0], [0], [1], [0, 0, 1, 1], [], []>} : vector<8x8xbf16>, vector<8x8xbf16>, vector<8x8xf32> -> vector<8x8xf32>
    %297 = tpu.concatenate %248, %264, %280, %296 in 1 : vector<8x8xf32>, vector<8x8xf32>, vector<8x8xf32>, vector<8x8xf32> -> vector<8x32xf32>
    %298 = vector.extract_strided_slice %230 {offsets = [8, 0], sizes = [8, 96], strides = [1, 1]} : vector<16x96xbf16> to vector<8x96xbf16>
    %299 = vector.extract_strided_slice %230 {offsets = [8, 0], sizes = [8, 96], strides = [1, 1]} : vector<16x96xbf16> to vector<8x96xbf16>
    %300 = vector.extract_strided_slice %298 {offsets = [0, 0], sizes = [8, 8], strides = [1, 1]} : vector<8x96xbf16> to vector<8x8xbf16>
    %301 = vector.extract_strided_slice %299 {offsets = [0, 32], sizes = [8, 8], strides = [1, 1]} : vector<8x96xbf16> to vector<8x8xbf16>
    %302 = vector.extract_strided_slice %299 {offsets = [0, 64], sizes = [8, 8], strides = [1, 1]} : vector<8x96xbf16> to vector<8x8xbf16>
    %cst_87 = arith.constant dense<0.000000e+00> : vector<8x8xf32>
    %303 = tpu.matmul %300, %301, %cst_87 {dimension_numbers = #tpu.dot_dimension_numbers<[1], [1], [0], [0], [0, 0, 1, 0], [], []>} : vector<8x8xbf16>, vector<8x8xbf16>, vector<8x8xf32> -> vector<8x8xf32>
    %cst_88 = arith.constant dense<0xFF800000> : vector<8xf32>
    %304 = vector.multi_reduction <maximumf>, %303, %cst_88 [1] : vector<8x8xf32> to vector<8xf32>
    %305 = vector.shape_cast %304 : vector<8xf32> to vector<8x1xf32>
    %306 = vector.broadcast %305 : vector<8x1xf32> to vector<8x8xf32>
    %307 = arith.subf %303, %306 : vector<8x8xf32>
    %308 = math.exp %307 : vector<8x8xf32>
    %cst_89 = arith.constant dense<0.000000e+00> : vector<8xf32>
    %309 = vector.multi_reduction <add>, %308, %cst_89 [1] : vector<8x8xf32> to vector<8xf32>
    %310 = vector.shape_cast %309 : vector<8xf32> to vector<8x1xf32>
    %311 = tpu.reciprocal %310 {approx = true} : vector<8x1xf32> -> vector<8x1xf32>
    %312 = vector.broadcast %311 : vector<8x1xf32> to vector<8x8xf32>
    %313 = arith.mulf %308, %312 : vector<8x8xf32>
    %314 = arith.truncf %313 : vector<8x8xf32> to vector<8x8xbf16>
    %cst_90 = arith.constant dense<0.000000e+00> : vector<8x8xf32>
    %315 = tpu.matmul %314, %302, %cst_90 {dimension_numbers = #tpu.dot_dimension_numbers<[1], [0], [0], [1], [0, 0, 1, 1], [], []>} : vector<8x8xbf16>, vector<8x8xbf16>, vector<8x8xf32> -> vector<8x8xf32>
    %316 = vector.extract_strided_slice %298 {offsets = [0, 8], sizes = [8, 8], strides = [1, 1]} : vector<8x96xbf16> to vector<8x8xbf16>
    %317 = vector.extract_strided_slice %299 {offsets = [0, 40], sizes = [8, 8], strides = [1, 1]} : vector<8x96xbf16> to vector<8x8xbf16>
    %318 = vector.extract_strided_slice %299 {offsets = [0, 72], sizes = [8, 8], strides = [1, 1]} : vector<8x96xbf16> to vector<8x8xbf16>
    %cst_91 = arith.constant dense<0.000000e+00> : vector<8x8xf32>
    %319 = tpu.matmul %316, %317, %cst_91 {dimension_numbers = #tpu.dot_dimension_numbers<[1], [1], [0], [0], [0, 0, 1, 0], [], []>} : vector<8x8xbf16>, vector<8x8xbf16>, vector<8x8xf32> -> vector<8x8xf32>
    %cst_92 = arith.constant dense<0xFF800000> : vector<8xf32>
    %320 = vector.multi_reduction <maximumf>, %319, %cst_92 [1] : vector<8x8xf32> to vector<8xf32>
    %321 = vector.shape_cast %320 : vector<8xf32> to vector<8x1xf32>
    %322 = vector.broadcast %321 : vector<8x1xf32> to vector<8x8xf32>
    %323 = arith.subf %319, %322 : vector<8x8xf32>
    %324 = math.exp %323 : vector<8x8xf32>
    %cst_93 = arith.constant dense<0.000000e+00> : vector<8xf32>
    %325 = vector.multi_reduction <add>, %324, %cst_93 [1] : vector<8x8xf32> to vector<8xf32>
    %326 = vector.shape_cast %325 : vector<8xf32> to vector<8x1xf32>
    %327 = tpu.reciprocal %326 {approx = true} : vector<8x1xf32> -> vector<8x1xf32>
    %328 = vector.broadcast %327 : vector<8x1xf32> to vector<8x8xf32>
    %329 = arith.mulf %324, %328 : vector<8x8xf32>
    %330 = arith.truncf %329 : vector<8x8xf32> to vector<8x8xbf16>
    %cst_94 = arith.constant dense<0.000000e+00> : vector<8x8xf32>
    %331 = tpu.matmul %330, %318, %cst_94 {dimension_numbers = #tpu.dot_dimension_numbers<[1], [0], [0], [1], [0, 0, 1, 1], [], []>} : vector<8x8xbf16>, vector<8x8xbf16>, vector<8x8xf32> -> vector<8x8xf32>
    %332 = vector.extract_strided_slice %298 {offsets = [0, 16], sizes = [8, 8], strides = [1, 1]} : vector<8x96xbf16> to vector<8x8xbf16>
    %333 = vector.extract_strided_slice %299 {offsets = [0, 48], sizes = [8, 8], strides = [1, 1]} : vector<8x96xbf16> to vector<8x8xbf16>
    %334 = vector.extract_strided_slice %299 {offsets = [0, 80], sizes = [8, 8], strides = [1, 1]} : vector<8x96xbf16> to vector<8x8xbf16>
    %cst_95 = arith.constant dense<0.000000e+00> : vector<8x8xf32>
    %335 = tpu.matmul %332, %333, %cst_95 {dimension_numbers = #tpu.dot_dimension_numbers<[1], [1], [0], [0], [0, 0, 1, 0], [], []>} : vector<8x8xbf16>, vector<8x8xbf16>, vector<8x8xf32> -> vector<8x8xf32>
    %cst_96 = arith.constant dense<0xFF800000> : vector<8xf32>
    %336 = vector.multi_reduction <maximumf>, %335, %cst_96 [1] : vector<8x8xf32> to vector<8xf32>
    %337 = vector.shape_cast %336 : vector<8xf32> to vector<8x1xf32>
    %338 = vector.broadcast %337 : vector<8x1xf32> to vector<8x8xf32>
    %339 = arith.subf %335, %338 : vector<8x8xf32>
    %340 = math.exp %339 : vector<8x8xf32>
    %cst_97 = arith.constant dense<0.000000e+00> : vector<8xf32>
    %341 = vector.multi_reduction <add>, %340, %cst_97 [1] : vector<8x8xf32> to vector<8xf32>
    %342 = vector.shape_cast %341 : vector<8xf32> to vector<8x1xf32>
    %343 = tpu.reciprocal %342 {approx = true} : vector<8x1xf32> -> vector<8x1xf32>
    %344 = vector.broadcast %343 : vector<8x1xf32> to vector<8x8xf32>
    %345 = arith.mulf %340, %344 : vector<8x8xf32>
    %346 = arith.truncf %345 : vector<8x8xf32> to vector<8x8xbf16>
    %cst_98 = arith.constant dense<0.000000e+00> : vector<8x8xf32>
    %347 = tpu.matmul %346, %334, %cst_98 {dimension_numbers = #tpu.dot_dimension_numbers<[1], [0], [0], [1], [0, 0, 1, 1], [], []>} : vector<8x8xbf16>, vector<8x8xbf16>, vector<8x8xf32> -> vector<8x8xf32>
    %348 = vector.extract_strided_slice %298 {offsets = [0, 24], sizes = [8, 8], strides = [1, 1]} : vector<8x96xbf16> to vector<8x8xbf16>
    %349 = vector.extract_strided_slice %299 {offsets = [0, 56], sizes = [8, 8], strides = [1, 1]} : vector<8x96xbf16> to vector<8x8xbf16>
    %350 = vector.extract_strided_slice %299 {offsets = [0, 88], sizes = [8, 8], strides = [1, 1]} : vector<8x96xbf16> to vector<8x8xbf16>
    %cst_99 = arith.constant dense<0.000000e+00> : vector<8x8xf32>
    %351 = tpu.matmul %348, %349, %cst_99 {dimension_numbers = #tpu.dot_dimension_numbers<[1], [1], [0], [0], [0, 0, 1, 0], [], []>} : vector<8x8xbf16>, vector<8x8xbf16>, vector<8x8xf32> -> vector<8x8xf32>
    %cst_100 = arith.constant dense<0xFF800000> : vector<8xf32>
    %352 = vector.multi_reduction <maximumf>, %351, %cst_100 [1] : vector<8x8xf32> to vector<8xf32>
    %353 = vector.shape_cast %352 : vector<8xf32> to vector<8x1xf32>
    %354 = vector.broadcast %353 : vector<8x1xf32> to vector<8x8xf32>
    %355 = arith.subf %351, %354 : vector<8x8xf32>
    %356 = math.exp %355 : vector<8x8xf32>
    %cst_101 = arith.constant dense<0.000000e+00> : vector<8xf32>
    %357 = vector.multi_reduction <add>, %356, %cst_101 [1] : vector<8x8xf32> to vector<8xf32>
    %358 = vector.shape_cast %357 : vector<8xf32> to vector<8x1xf32>
    %359 = tpu.reciprocal %358 {approx = true} : vector<8x1xf32> -> vector<8x1xf32>
    %360 = vector.broadcast %359 : vector<8x1xf32> to vector<8x8xf32>
    %361 = arith.mulf %356, %360 : vector<8x8xf32>
    %362 = arith.truncf %361 : vector<8x8xf32> to vector<8x8xbf16>
    %cst_102 = arith.constant dense<0.000000e+00> : vector<8x8xf32>
    %363 = tpu.matmul %362, %350, %cst_102 {dimension_numbers = #tpu.dot_dimension_numbers<[1], [0], [0], [1], [0, 0, 1, 1], [], []>} : vector<8x8xbf16>, vector<8x8xbf16>, vector<8x8xf32> -> vector<8x8xf32>
    %364 = tpu.concatenate %315, %331, %347, %363 in 1 : vector<8x8xf32>, vector<8x8xf32>, vector<8x8xf32>, vector<8x8xf32> -> vector<8x32xf32>
    %365 = tpu.concatenate %297, %364 in 0 : vector<8x32xf32>, vector<8x32xf32> -> vector<16x32xf32>
    %366 = arith.truncf %365 : vector<16x32xf32> to vector<16x32xbf16>
    %c0_103 = arith.constant 0 : index
    %c0_104 = arith.constant 0 : index
    %367 = vector.load %arg12[%c0_103, %c0_104] : memref<32x32xbf16, #tpu.memory_space<vmem>>, vector<32x32xbf16>
    %cst_105 = arith.constant dense<0.000000e+00> : vector<16x32xf32>
    %368 = tpu.matmul %366, %367, %cst_105 {dimension_numbers = #tpu.dot_dimension_numbers<[1], [0], [0], [1], [0, 0, 1, 1], [], []>} : vector<16x32xbf16>, vector<32x32xbf16>, vector<16x32xf32> -> vector<16x32xf32>
    %369 = vector.broadcast %12 : vector<1x32xf32> to vector<16x32xf32>
    %370 = arith.addf %368, %369 : vector<16x32xf32>
    %371 = arith.truncf %370 : vector<16x32xf32> to vector<16x32xbf16>
    %c0_106 = arith.constant 0 : index
    %c0_107 = arith.constant 0 : index
    %372 = vector.load %arg13[%c0_106, %c0_107] : memref<32x64xbf16, #tpu.memory_space<vmem>>, vector<32x64xbf16>
    %cst_108 = arith.constant dense<0.000000e+00> : vector<16x64xf32>
    %373 = tpu.matmul %371, %372, %cst_108 {dimension_numbers = #tpu.dot_dimension_numbers<[1], [0], [0], [1], [0, 0, 1, 1], [], []>} : vector<16x32xbf16>, vector<32x64xbf16>, vector<16x64xf32> -> vector<16x64xf32>
    %374 = vector.broadcast %13 : vector<1x64xf32> to vector<16x64xf32>
    %375 = arith.addf %373, %374 : vector<16x64xf32>
    %cst_109 = arith.constant 0.000000e+00 : f32
    %376 = vector.broadcast %cst_109 : f32 to vector<16x64xf32>
    %377 = arith.maximumf %375, %376 : vector<16x64xf32>
    %378 = arith.truncf %377 : vector<16x64xf32> to vector<16x64xbf16>
    %c0_110 = arith.constant 0 : index
    %c0_111 = arith.constant 0 : index
    %379 = vector.load %arg14[%c0_110, %c0_111] : memref<64x32xbf16, #tpu.memory_space<vmem>>, vector<64x32xbf16>
    %cst_112 = arith.constant dense<0.000000e+00> : vector<16x32xf32>
    %380 = tpu.matmul %378, %379, %cst_112 {dimension_numbers = #tpu.dot_dimension_numbers<[1], [0], [0], [1], [0, 0, 1, 1], [], []>} : vector<16x64xbf16>, vector<64x32xbf16>, vector<16x32xf32> -> vector<16x32xf32>
    %381 = vector.broadcast %14 : vector<1x32xf32> to vector<16x32xf32>
    %382 = arith.addf %380, %381 : vector<16x32xf32>
    %383 = arith.addf %224, %382 : vector<16x32xf32>
    %cst_113 = arith.constant dense<0.000000e+00> : vector<16xf32>
    %384 = vector.multi_reduction <add>, %383, %cst_113 [1] : vector<16x32xf32> to vector<16xf32>
    %385 = vector.shape_cast %384 : vector<16xf32> to vector<16x1xf32>
    %cst_114 = arith.constant 3.200000e+01 : f32
    %386 = vector.broadcast %cst_114 : f32 to vector<16x1xf32>
    %387 = arith.divf %385, %386 : vector<16x1xf32>
    %388 = vector.broadcast %387 : vector<16x1xf32> to vector<16x32xf32>
    %389 = arith.subf %383, %388 : vector<16x32xf32>
    %390 = arith.mulf %389, %389 : vector<16x32xf32>
    %cst_115 = arith.constant dense<0.000000e+00> : vector<16xf32>
    %391 = vector.multi_reduction <add>, %390, %cst_115 [1] : vector<16x32xf32> to vector<16xf32>
    %392 = vector.shape_cast %391 : vector<16xf32> to vector<16x1xf32>
    %cst_116 = arith.constant 3.200000e+01 : f32
    %393 = vector.broadcast %cst_116 : f32 to vector<16x1xf32>
    %394 = arith.divf %392, %393 : vector<16x1xf32>
    %395 = vector.broadcast %387 : vector<16x1xf32> to vector<16x32xf32>
    %396 = arith.subf %383, %395 : vector<16x32xf32>
    %cst_117 = arith.constant 9.99999974E-6 : f32
    %397 = vector.broadcast %cst_117 : f32 to vector<16x1xf32>
    %398 = arith.addf %394, %397 : vector<16x1xf32>
    %399 = math.rsqrt %398 : vector<16x1xf32>
    %400 = vector.broadcast %399 : vector<16x1xf32> to vector<16x32xf32>
    %401 = arith.mulf %396, %400 : vector<16x32xf32>
    %402 = vector.broadcast %15 : vector<1x32xf32> to vector<16x32xf32>
    %403 = arith.mulf %401, %402 : vector<16x32xf32>
    %404 = vector.broadcast %16 : vector<1x32xf32> to vector<16x32xf32>
    %405 = arith.addf %403, %404 : vector<16x32xf32>
    %c0_118 = arith.constant 0 : index
    %c0_119 = arith.constant 0 : index
    %406 = vector.load %arg16[%c0_118, %c0_119] : memref<16x32xf32, #tpu.memory_space<vmem>>, vector<16x32xf32>
    tpu.vector_store %arg16[%c0_118, %c0_119], %405 {strides = array<i32>} : memref<16x32xf32, #tpu.memory_space<vmem>>, vector<16x32xf32>,
    return
  }
  func.func @transform_0(%arg0: i32) -> (i32, i32) {
    %c0_i32 = arith.constant 0 : i32
    %c0_i32_0 = arith.constant 0 : i32
    return %arg0, %c0_i32 : i32, i32
  }
  func.func @transform_1(%arg0: i32) -> (i32, i32) {
    %c0_i32 = arith.constant 0 : i32
    %c0_i32_0 = arith.constant 0 : i32
    return %arg0, %c0_i32 : i32, i32
  }
  func.func @transform_2(%arg0: i32) -> (i32, i32) {
    %c0_i32 = arith.constant 0 : i32
    %c0_i32_0 = arith.constant 0 : i32
    %c0_i32_1 = arith.constant 0 : i32
    return %c0_i32, %c0_i32_0 : i32, i32
  }
  func.func @transform_3(%arg0: i32) -> (i32, i32) {
    %c0_i32 = arith.constant 0 : i32
    %c0_i32_0 = arith.constant 0 : i32
    %c0_i32_1 = arith.constant 0 : i32
    return %c0_i32, %c0_i32_0 : i32, i32
  }
  func.func @transform_4(%arg0: i32) -> (i32, i32) {
    %c0_i32 = arith.constant 0 : i32
    %c0_i32_0 = arith.constant 0 : i32
    %c0_i32_1 = arith.constant 0 : i32
    return %c0_i32, %c0_i32_0 : i32, i32
  }
  func.func @transform_5(%arg0: i32) -> (i32, i32) {
    %c0_i32 = arith.constant 0 : i32
    %c0_i32_0 = arith.constant 0 : i32
    %c0_i32_1 = arith.constant 0 : i32
    return %c0_i32, %c0_i32_0 : i32, i32
  }
  func.func @transform_6(%arg0: i32) -> (i32, i32) {
    %c0_i32 = arith.constant 0 : i32
    %c0_i32_0 = arith.constant 0 : i32
    %c0_i32_1 = arith.constant 0 : i32
    return %c0_i32, %c0_i32_0 : i32, i32
  }
  func.func @transform_7(%arg0: i32) -> (i32, i32) {
    %c0_i32 = arith.constant 0 : i32
    %c0_i32_0 = arith.constant 0 : i32
    %c0_i32_1 = arith.constant 0 : i32
    return %c0_i32, %c0_i32_0 : i32, i32
  }
  func.func @transform_8(%arg0: i32) -> (i32, i32) {
    %c0_i32 = arith.constant 0 : i32
    %c0_i32_0 = arith.constant 0 : i32
    %c0_i32_1 = arith.constant 0 : i32
    return %c0_i32, %c0_i32_0 : i32, i32
  }
  func.func @transform_9(%arg0: i32) -> (i32, i32) {
    %c0_i32 = arith.constant 0 : i32
    %c0_i32_0 = arith.constant 0 : i32
    %c0_i32_1 = arith.constant 0 : i32
    return %c0_i32, %c0_i32_0 : i32, i32
  }
  func.func @transform_10(%arg0: i32) -> (i32, i32) {
    %c0_i32 = arith.constant 0 : i32
    %c0_i32_0 = arith.constant 0 : i32
    %c0_i32_1 = arith.constant 0 : i32
    return %c0_i32, %c0_i32_0 : i32, i32
  }
  func.func @transform_11(%arg0: i32) -> (i32, i32) {
    %c0_i32 = arith.constant 0 : i32
    %c0_i32_0 = arith.constant 0 : i32
    %c0_i32_1 = arith.constant 0 : i32
    return %c0_i32, %c0_i32_0 : i32, i32
  }
  func.func @transform_12(%arg0: i32) -> (i32, i32) {
    %c0_i32 = arith.constant 0 : i32
    %c0_i32_0 = arith.constant 0 : i32
    %c0_i32_1 = arith.constant 0 : i32
    return %c0_i32, %c0_i32_0 : i32, i32
  }
  func.func @transform_13(%arg0: i32) -> (i32, i32) {
    %c0_i32 = arith.constant 0 : i32
    %c0_i32_0 = arith.constant 0 : i32
    %c0_i32_1 = arith.constant 0 : i32
    return %c0_i32, %c0_i32_0 : i32, i32
  }
  func.func @transform_14(%arg0: i32) -> (i32, i32) {
    %c0_i32 = arith.constant 0 : i32
    %c0_i32_0 = arith.constant 0 : i32
    %c0_i32_1 = arith.constant 0 : i32
    return %c0_i32, %c0_i32_0 : i32, i32
  }
  func.func @transform_15(%arg0: i32) -> (i32, i32) {
    %c0_i32 = arith.constant 0 : i32
    %c0_i32_0 = arith.constant 0 : i32
    return %arg0, %c0_i32 : i32, i32
  }
}

</mosaic_0001>

<bundles_post_ra>
// kernel: tpu_custom_call.1
= control target key start
LH: loop header
LB: loop body
LE: loop exit
PB: predicated region body
PF: predicated region fallthrough
CT: control target
= control target key end

     0   :  { %20 = vsyncpa [#allocation3], 0  ;;  %s2755_s0 = inlined_call_operand.vmem [shape: f32[16,32], index: 0, kind: input, shape index: {}]   ;;  %s2756_s1 = inlined_call_operand.vmem [shape: f32[32,3], index: 1, kind: input, shape index: {}]   ;;  %s2757_s2 = inlined_call_operand.hbm [shape: bf16[3,4], index: 2, kind: input, shape index: {}]   ;;  %s2758_s3 = inlined_call_operand.hbm [shape: bf16[4,8], index: 3, kind: input, shape index: {}]   ;;  %s2759_s4 = inlined_call_operand.hbm [shape: bf16[8,16], index: 4, kind: input, shape index: {}]   ;;  %s2760_s5 = inlined_call_operand.hbm [shape: bf16[16,32], index: 5, kind: input, shape index: {}]   ;;  %s2761_s6 = inlined_call_operand.vmem [shape: bf16[32,32], index: 6, kind: input, shape index: {}]   ;;  %s2762_s7 = inlined_call_operand.vmem [shape: bf16[32,64], index: 7, kind: input, shape index: {}]   ;;  %s2763_s8 = inlined_call_operand.vmem [shape: bf16[32,32], index: 8, kind: input, shape index: {}]   ;;  %s2764_s9 = inlined_call_operand.hbm [shape: bf16[32,32], index: 9, kind: input, shape index: {}]   ;;  %s2765_s10 = inlined_call_operand.hbm [shape: bf16[32,96], index: 10, kind: input, shape index: {}]   ;;  %s2766_s11 = inlined_call_operand.hbm [shape: bf16[32,32], index: 11, kind: input, shape index: {}]   ;;  %s2767_s12 = inlined_call_operand.hbm [shape: bf16[32,64], index: 12, kind: input, shape index: {}]   ;;  %s2768_s13 = inlined_call_operand.vmem [shape: bf16[64,32], index: 13, kind: input, shape index: {}]   ;;  %s2769_s14 = inlined_call_operand.vmem [shape: f32[16,128], index: 14, kind: input, shape index: {}]   ;;  %s2770_s15 = inlined_call_operand.hbm [shape: f32[16,32], index: 15, kind: output, shape index: {}]  }
   0x1   :  { %21 = vsyncpa [#allocation6], 0 }
   0x2   :  { %22 = vsyncpa [#allocation9], 0 }
   0x3   :  { %23 = vsyncpa [#allocation12], 0 }
   0x4   :  { %24 = vsyncpa [#allocation15], 0  ;;  %s46_s20 = sshll.u32 %s2758_s3, 4  ;;  %s47_s20 = int_to_ptr.hbm [resolvable:$true] %s46_s20 }
   0x5   :  { %25 = vsyncpa [#allocation4], 0  ;;  %s2241_s21 = smov [#allocation5]   ;;  %s67_s25 = sshll.u32 %s2760_s5, 4  ;;  %s68_s25 = int_to_ptr.hbm [resolvable:$true] %s67_s25 }
   0x6   :  { %s48_s22 = sshll.u32 %s2241_s21, 4  ;;  %s2242_s26 = smov [#allocation8]   ;;  %s49_s22 = int_to_ptr.vmem [resolvable:$true] %s48_s22 }
   0x7   :  { %51 = dma.hbm_to_vmem [thread:$0]  %s47_s20, 32, %s49_s22, [#allocation6]  }
   0x8   :  { %s69_s27 = sshll.u32 %s2242_s26, 4  ;;  %s2243_s28 = smov 64   ;;  %s70_s27 = int_to_ptr.vmem [resolvable:$true] %s69_s27 }
   0x9   :  { %s2244_s29 = smov 4   ;;  %s99_s16 = sshll.u32 %s2765_s10, 4  ;;  %s100_s16 = int_to_ptr.hbm [resolvable:$true] %s99_s16 }
   0xa   :  { %75 = dma.hbm_to_vmem [thread:$0]  %s68_s25, 128, %s70_s27, [#allocation9], %s2243_s28, %s2243_s28, %s2244_s29  }
   0xb   :  { %s2245_s17 = smov [#allocation11]   ;;  %s35_s20 = sshll.u32 %s2757_s2, 4  ;;  %s36_s20 = int_to_ptr.hbm [resolvable:$true] %s35_s20 }
   0xc   :  { %s101_s18 = sshll.u32 %s2245_s17, 4  ;;  %s2246_s21 = smov [#allocation2]   ;;  %s102_s18 = int_to_ptr.vmem [resolvable:$true] %s101_s18 }
   0xd   :  { %107 = dma.hbm_to_vmem [thread:$0]  %s100_s16, 256, %s102_s18, [#allocation12], %s2243_s28, %s2243_s28, %s2244_s29  }
   0xe   :  { %s37_s22 = sshll.u32 %s2246_s21, 4  ;;  %s57_s25 = sshll.u32 %s2759_s4, 4  ;;  %s38_s22 = int_to_ptr.vmem [resolvable:$true] %s37_s22  ;;  %s58_s25 = int_to_ptr.hbm [resolvable:$true] %s57_s25 }
   0xf   :  { %40 = dma.hbm_to_vmem [thread:$0]  %s36_s20, 32, %s38_s22, [#allocation3]  }
  0x10   :  { %s86_s27 = sshll.u32 %s2764_s9, 4  ;;  %s2247_s3 = smov [#allocation7]   ;;  %s87_s27 = int_to_ptr.hbm [resolvable:$true] %s86_s27 }
  0x11   :  { %s59_s2 = sshll.u32 %s2247_s3, 4  ;;  %s2248_s30 = smov [#allocation10]   ;;  %s60_s2 = int_to_ptr.vmem [resolvable:$true] %s59_s2 }
  0x12   :  { %62 = dma.hbm_to_vmem [thread:$0]  %s58_s25, 64, %s60_s2, [#allocation6]  }
  0x13   :  { %s88_s16 = sshll.u32 %s2248_s30, 4  ;;  %s112_s5 = sshll.u32 %s2766_s11, 4  ;;  %s89_s16 = int_to_ptr.vmem [resolvable:$true] %s88_s16  ;;  %s113_s5 = int_to_ptr.hbm [resolvable:$true] %s112_s5 }
  0x14   :  { %94 = dma.hbm_to_vmem [thread:$0]  %s87_s27, 256, %s89_s16, [#allocation9], %s2243_s28, %s2243_s28, %s2244_s29  }
  0x15   :  { %s125_s9 = sshll.u32 %s2767_s12, 4  ;;  %s2249_s20 = smov [#allocation13]   ;;  %s126_s9 = int_to_ptr.hbm [resolvable:$true] %s125_s9 }
  0x16   :  { %s114_s21 = sshll.u32 %s2249_s20, 4  ;;  %s2250_s22 = smov [#allocation14]   ;;  %s115_s21 = int_to_ptr.vmem [resolvable:$true] %s114_s21 }
  0x17   :  { %120 = dma.hbm_to_vmem [thread:$0]  %s113_s5, 256, %s115_s21, [#allocation12], %s2243_s28, %s2243_s28, %s2244_s29  }
  0x18   :  { %s127_s11 = sshll.u32 %s2250_s22, 4  ;;  %s128_s11 = int_to_ptr.vmem [resolvable:$true] %s127_s11 }
  0x19   :  { %133 = dma.hbm_to_vmem [thread:$0]  %s126_s9, 256, %s128_s11, [#allocation15], %s2243_s28, %s2243_s28, %s2244_s29  }
  0x1a   :  { %2229 = dma.done.wait [#allocation3], 32  }
  0x1b   :  { %2230 = vsyncadd [#allocation3], 4294967264 }
  0x1c   :  { %2231 = dma.done.wait [#allocation6], 96  }
  0x1d   :  { %2232 = vsyncadd [#allocation6], 4294967200 }
  0x1e   :  { %2233 = dma.done.wait [#allocation9], 384  }
  0x1f   :  { %2234 = vsyncadd [#allocation9], 4294966912 }
  0x20   :  { %2235 = dma.done.wait [#allocation12], 512  }
  0x21   :  { %2236 = vsyncadd [#allocation12], 4294966784 }
  0x22   :  { %2237 = dma.done.wait [#allocation15], 256  }
  0x23   :  { %2238 = vsyncadd [#allocation15], 4294967040  ;;  %vm190_vm0 = vcmask 1040384   ;;  %vm191_vm1 = vcmask 1041408   ;;  %v2251_v0 = vmov 65535   ;;  %v175_v4 = vld [vmem:[%s2756_s1] sm:$0xff] }
  0x24   :  { %v192_v1 = vsel %vm190_vm0, 4294967295, %v2251_v0  ;;  %v181_v3 = vld [vmem:[#allocation2] sm:$0x3]  ;;  %v176_v5 = vld [vmem:[%s2756_s1 + $0x8] sm:$0xff]  ;;  %vm183_vm2 = vcmask 23552   ;;  %v177_v8 = vld [vmem:[%s2756_s1 + $0x10] sm:$0xff] }
  0x25   :  { %v193_v2 = vsel %vm191_vm1, %v192_v1, 0  ;;  %v179_v7 = vpack.c.bf16 %v176_v5, %v175_v4  ;;  %v178_v9 = vld [vmem:[%s2756_s1 + $0x18] sm:$0xff]  ;;  %v222_v11 = vld [vmem:[#allocation5] sm:$0x3]  ;;  %vm224_vm3 = vcmask 31744   ;;  %vm268_vm4 = vcmask 1043456  }
  0x26   :  { %v195_v6 = vand.u32 %v193_v2, %v181_v3  ;;  %v180_v10 = vpack.c.bf16 %v178_v9, %v177_v8  ;;  %v232_v12 = vsel %vm191_vm1, %v222_v11, 0  ;;  %v2404_v13 = vld [vmem:[%s2769_s14] sm:$0xff]  ;;  %vm261_vm5 = vcmask 64512   ;;  %v1863_v46 = vld [vmem:[#allocation8] sm:$0xff]  ;;  %s2255_s11 = smov 96   ;;  %s2256_s12 = smov 88  }
  0x27   :  { %241 = vmatpush.bf16.msra.mxu1 %v232_v12  ;;  %v182_v15 = vperm.slane %v2404_v13, 0  ;;  %v259_v29 = vld [vmem:[#allocation7] sm:$0xf]  ;;  %v223_v32 = vperm.slane %v2404_v13, 1  ;;  %320 = vmatpush.bf16.msra.mxu3 %v1863_v46  ;;  %v260_v48 = vperm.slane %v2404_v13, 2  ;;  %vm306_vm6 = vcmask 130048  }
  0x28   :  { %204 = vmatpush.bf16.msra.mxu0 %v195_v6  ;;  %v270_v30 = vsel %vm268_vm4, %v259_v29, 0  ;;  %v1865_v62 = vld [vmem:[%s2761_s6 + $0x8] sm:$0xff]  ;;  %v1864_v0 = vld [vmem:[%s2761_s6] sm:$0xff]  ;;  %vm352_vm7 = vcmask 261120   ;;  %v299_v6 = vperm.slane %v2404_v13, 3  ;;  %s2253_s6 = smov 112  }
  0x29   :  { %279 = vmatpush.bf16.msra.mxu2 %v270_v30  ;;  %v1867_v63 = vld [vmem:[%s2762_s7 + $0x8] sm:$0xff]  ;;  %v1866_v1 = vld [vmem:[%s2762_s7] sm:$0xff]  ;;  %s2254_s7 = smov 104   ;;  %s2257_s23 = smov 80   ;;  %vm652_vm8 = vcmask 195584   ;;  %vm1643_vm0 = vcmask 523264  }
  0x2a   :  { %v2429_v2 = vld [vmem:[%s2755_s0] sm:$0xff]  ;;  %v2434_v3 = vld [vmem:[%s2755_s0 + $0x8] sm:$0xff]  ;;  %s2252_s0 = smov 120   ;;  %s2258_s29 = smov 72  }
  0x2b   :  { %1738 = vmatmul.msk.bf16.vlgmr.msra.gmra.mxu0 %vm183_vm2, %v179_v7  ;;  %401 = vmatpush.bf16.msrb.mxu1 %v1867_v63  ;;  %v334_v4 = vpack.c.bf16 %v2434_v3, %v2429_v2  ;;  %s2259_s24 = smov 8   ;;  %s2260_s25 = smov 24  }
  0x2c   :  { %362 = vmatpush.bf16.msrb.mxu0 %v1865_v62  ;;  %s2261_s27 = smov 16   ;;  %s2264_s30 = smov 48  }
  0x2d   :  { %s2265_s16 = smov 40  }
  0x2f   :  { %402 = vmatpush.bf16.msrb.mxu1 %v1866_v1 }
  0x30   :  { %363 = vmatpush.bf16.msrb.mxu0 %v1864_v0 }
  0x3b   :  { %1739 = vmatmul.msk.bf16.gmra.mxu0 %vm183_vm2, %v180_v10 }
  0x4b   :  { %1758 = vmatmul.msk.bf16.vlgmr.msrb.gmra.mxu0 %vm352_vm7, %v334_v4 }
  0xa8   :  { %v206_v14 = vpop.f32.mrf.mxu0 }
  0xa9   :  { %v207_v16 = vadd.f32 %v206_v14, %v182_v15 }
  0xab   :  { %v216_v19 = vmax.f32 %v207_v16, 0.0 }
  0xb0   :  { %v208_v17 = vpop.f32.mrf.mxu0 }
  0xb1   :  { %v209_v18 = vadd.f32 %v208_v17, %v182_v15  ;;  %v339_v17 = vperm.slane %v2404_v13, 4 }
  0xb3   :  { %v217_v20 = vmax.f32 %v209_v18, 0.0 }
  0xb5   :  { %v220_v21 = vpack.c.bf16 %v217_v20, %v216_v19 }
  0xb7   :  { %1740 = vmatmul.msk.bf16.vlgmr.msra.gmra.mxu1 %vm224_vm3, %v220_v21 }
  0xb8   :  { %v211_v22 = vpop.f32.mrf.mxu0 }
  0xb9   :  { %v212_v23 = vadd.f32 %v211_v22, %v182_v15 }
  0xbb   :  { %v218_v25 = vmax.f32 %v212_v23, 0.0 }
  0xc0   :  { %v213_v24 = vpop.f32.mrf.mxu0 }
  0xc1   :  { %v214_v26 = vadd.f32 %v213_v24, %v182_v15  ;;  %v376_v24 = vperm.slane %v2404_v13, 5 }
  0xc3   :  { %v219_v27 = vmax.f32 %v214_v26, 0.0 }
  0xc5   :  { %v221_v28 = vpack.c.bf16 %v219_v27, %v218_v25 }
  0xc7   :  { %1741 = vmatmul.msk.bf16.gmra.mxu1 %vm224_vm3, %v221_v28 }
  0xc8   :  { %v365_v18 = vpop.f32.mrf.mxu0 }
  0xc9   :  { %v366_v19 = vadd.f32 %v365_v18, %v339_v17 }
  0xcb   :  { %v370_v20 = vpack.c.bf16 %v366_v19, %v366_v19 }
  0xcd   :  { %v474_v21 = vunpack.c.l.b16 %v370_v20 }
  0xcf   :  { %v475_v22 = vpack.c.b16 %v474_v21, %v474_v21 }
  0xd1   :  { %476 = vrot.lane.b32.xlu2 %v475_v22, %s2252_s0 }
 0x134   :  { %v243_v31 = vpop.f32.mrf.mxu1 }
 0x135   :  { %v244_v33 = vadd.f32 %v243_v31, %v223_v32 }
 0x137   :  { %v253_v36 = vmax.f32 %v244_v33, 0.0  ;;  %v367_v33 = vpop.f32.mrf.mxu0 }
 0x13c   :  { %v245_v34 = vpop.f32.mrf.mxu1 }
 0x13d   :  { %v246_v35 = vadd.f32 %v245_v34, %v223_v32 }
 0x13f   :  { %v254_v37 = vmax.f32 %v246_v35, 0.0 }
 0x141   :  { %v257_v38 = vpack.c.bf16 %v254_v37, %v253_v36  ;;  %v368_v36 = vadd.f32 %v367_v33, %v339_v17 }
 0x143   :  { %1742 = vmatmul.msk.bf16.vlgmr.msra.gmra.mxu2 %vm261_vm5, %v257_v38  ;;  %v2453_v37 = vpack.c.bf16 %v368_v36, %v368_v36 }
 0x144   :  { %v248_v39 = vpop.f32.mrf.mxu1 }
 0x145   :  { %v249_v40 = vadd.f32 %v248_v39, %v223_v32 }
 0x147   :  { %v255_v42 = vmax.f32 %v249_v40, 0.0 }
 0x14c   :  { %v250_v41 = vpop.f32.mrf.mxu1 }
 0x14d   :  { %v251_v43 = vadd.f32 %v250_v41, %v223_v32  ;;  %v710_v41 = vunpack.c.l.b16 %v2453_v37 }
 0x14f   :  { %v256_v44 = vmax.f32 %v251_v43, 0.0 }
 0x151   :  { %v258_v45 = vpack.c.bf16 %v256_v44, %v255_v42  ;;  %v711_v44 = vpack.c.b16 %v710_v41, %v710_v41 }
 0x153   :  { %1743 = vmatmul.msk.bf16.gmra.mxu2 %vm261_vm5, %v258_v45 }
 0x1c6   :  { %v281_v47 = vpop.f32.mrf.mxu2 }
 0x1c7   :  { %v282_v49 = vadd.f32 %v281_v47, %v260_v48 }
 0x1c9   :  { %v291_v52 = vmax.f32 %v282_v49, 0.0 }
 0x1ce   :  { %v283_v50 = vpop.f32.mrf.mxu2 }
 0x1cf   :  { %v284_v51 = vadd.f32 %v283_v50, %v260_v48 }
 0x1d1   :  { %v292_v53 = vmax.f32 %v284_v51, 0.0 }
 0x1d3   :  { %v295_v54 = vpack.c.bf16 %v292_v53, %v291_v52 }
 0x1d5   :  { %1748 = vmatmul.msk.bf16.vlgmr.msra.gmra.mxu3 %vm306_vm6, %v295_v54 }
 0x1d6   :  { %v286_v55 = vpop.f32.mrf.mxu2 }
 0x1d7   :  { %v287_v56 = vadd.f32 %v286_v55, %v260_v48 }
 0x1d9   :  { %v293_v58 = vmax.f32 %v287_v56, 0.0 }
 0x1de   :  { %v288_v57 = vpop.f32.mrf.mxu2 }
 0x1df   :  { %v289_v59 = vadd.f32 %v288_v57, %v260_v48  ;;  %v477_v48 = vpop.permute.xlu2 %476 }
 0x1e1   :  { %v294_v60 = vmax.f32 %v289_v59, 0.0 }
 0x1e3   :  { %v296_v61 = vpack.c.bf16 %v294_v60, %v293_v58 }
 0x1e5   :  { %1749 = vmatmul.msk.bf16.gmra.mxu3 %vm306_vm6, %v296_v61 }
 0x258   :  { %v322_v5 = vpop.f32.mrf.mxu3 }
 0x259   :  { %v323_v8 = vadd.f32 %v322_v5, %v299_v6 }
 0x260   :  { %v324_v7 = vpop.f32.mrf.mxu3 }
 0x261   :  { %v325_v9 = vadd.f32 %v324_v7, %v299_v6 }
 0x263   :  { %v332_v10 = vpack.c.bf16 %v325_v9, %v323_v8 }
 0x265   :  { %1767 = vmatmul.msk.bf16.vlgmr.msrb.gmra.mxu1 %vm352_vm7, %v332_v10 }
 0x268   :  { %v327_v11 = vpop.f32.mrf.mxu3 }
 0x269   :  { %v328_v12 = vadd.f32 %v327_v11, %v299_v6 }
 0x270   :  { %v329_v14 = vpop.f32.mrf.mxu3 }
 0x271   :  { %v330_v15 = vadd.f32 %v329_v14, %v299_v6 }
 0x273   :  { %v333_v16 = vpack.c.bf16 %v330_v15, %v328_v12 }
 0x275   :  { %1768 = vmatmul.msk.bf16.gmra.mxu1 %vm352_vm7, %v333_v16 }
 0x2e2   :  { %v404_v23 = vpop.f32.mrf.mxu1 }
 0x2e3   :  { %v405_v25 = vadd.f32 %v404_v23, %v376_v24 }
 0x2e5   :  { %v414_v27 = vpack.c.bf16 %v405_v25, %v405_v25 }
 0x2e7   :  { %v420_v30 = vunpack.c.l.b16 %v414_v27 }
 0x2ea   :  { %v406_v26 = vpop.f32.mrf.mxu1 }
 0x2eb   :  { %v407_v28 = vadd.f32 %v406_v26, %v376_v24 }
 0x2ed   :  { %v415_v29 = vpack.c.bf16 %v407_v28, %v407_v28 }
 0x2ef   :  { %v421_v31 = vunpack.c.l.b16 %v415_v29 }
 0x2f1   :  { %v2445_v32 = vpack.c.b16 %v421_v31, %v420_v30 }
 0x2f2   :  { %v409_v34 = vpop.f32.mrf.mxu1 }
 0x2f3   :  { %532 = vrot.lane.b32.xlu2 %v2445_v32, %s2253_s6  ;;  %478 = vrot.lane.b32.xlu1 %v2445_v32, %s2252_s0  ;;  %v427_v35 = vsel %vm261_vm5, %v2445_v32, 0  ;;  %v410_v39 = vadd.f32 %v409_v34, %v376_v24 }
 0x2f4   :  { %436 = vmatpush.bf16.xpose.msrb.mxu2 %v427_v35 }
 0x2f5   :  { %v416_v42 = vpack.c.bf16 %v410_v39, %v410_v39 }
 0x2f7   :  { %v656_v45 = vunpack.c.l.b16 %v416_v42 }
 0x2fa   :  { %v411_v38 = vpop.f32.mrf.mxu1 }
 0x2fb   :  { %584 = vrot.lane.b32.xlu2 %v475_v22, %s2254_s7  ;;  %454 = vrot.lane.b32.xlu1 %v2445_v32, %s2255_s11  ;;  %v412_v40 = vadd.f32 %v411_v38, %v376_v24 }
 0x2fc   :  { %1769 = vmatmul.msk.bf16.vlgmr.msrb.gmra.mxu2 %vm261_vm5, %v370_v20 }
 0x2fd   :  { %v417_v43 = vpack.c.bf16 %v412_v40, %v412_v40 }
 0x2ff   :  { %v657_v46 = vunpack.c.l.b16 %v417_v43 }
 0x301   :  { %v2462_v47 = vpack.c.b16 %v657_v46, %v656_v45 }
 0x303   :  { %712 = vrot.lane.b32.xlu2 %v711_v44, %s2252_s0  ;;  %530 = vrot.lane.b32.xlu1 %v475_v22, %s2253_s6  ;;  %v663_v17 = vsel %vm261_vm5, %v2462_v47, 0 }
 0x30b   :  { %714 = vrot.lane.b32.xlu1 %v2462_v47, %s2252_s0  ;;  %822 = vrot.lane.b32.xlu2 %v2462_v47, %s2254_s7 }
 0x313   :  { %768 = vrot.lane.b32.xlu1 %v2462_v47, %s2253_s6 }
 0x31b   :  { %820 = vrot.lane.b32.xlu1 %v711_v44, %s2254_s7 }
 0x34d   :  { %v533_v51 = vpop.permute.xlu2 %532 }
 0x34e   :  { %v538_v53 = vsel %vm261_vm5, %v533_v51, 0 }
 0x355   :  { %v585_v1 = vpop.permute.xlu2 %584 }
 0x35d   :  { %v713_v4 = vpop.permute.xlu2 %712 }
 0x365   :  { %v479_v49 = vpop.permute.xlu1 %478  ;;  %v823_v5 = vpop.permute.xlu2 %822 }
 0x366   :  { %v484_v50 = vsel %vm261_vm5, %v479_v49, 0  ;;  %v828_v24 = vsel %vm261_vm5, %v823_v5, 0 }
 0x367   :  { %493 = vmatpush.bf16.xpose.msra.mxu0 %v484_v50 }
 0x36d   :  { %v455_v52 = vpop.permute.xlu1 %454 }
 0x36e   :  { %467 = vmatpush.bf16.msrb.mxu3 %v455_v52  ;;  %1771 = vmatmul.msk.bf16.vlgmr.msra.gmra.mxu0 %vm261_vm5, %v477_v48 }
 0x372   :  { %547 = vmatpush.bf16.xpose.msra.mxu3 %v538_v53 }
 0x375   :  { %v531_v12 = vpop.permute.xlu1 %530 }
 0x37d   :  { %v715_v18 = vpop.permute.xlu1 %714 }
 0x37e   :  { %v720_v19 = vsel %vm261_vm5, %v715_v18, 0 }
 0x37f   :  { %v438_v54 = vpop.f32.mrf.mxu2 }
 0x380   :  { %v442_v55 = vsel %vm306_vm6, %v438_v54, -inf }
 0x381   :  { %443 = vmax.xlane.f32.xlu0 %v442_v55 }
 0x385   :  { %v769_v22 = vpop.permute.xlu1 %768 }
 0x386   :  { %v774_v23 = vsel %vm261_vm5, %v769_v22, 0 }
 0x387   :  { %v440_v56 = vpop.f32.mrf.mxu2 }
 0x38d   :  { %v821_v25 = vpop.permute.xlu1 %820 }
 0x3eb   :  { %v495_v57 = vpop.f32.mrf.mxu0 }
 0x3ec   :  { %v499_v58 = vsel %vm306_vm6, %v495_v57, -inf }
 0x3ed   :  { %500 = vmax.xlane.f32.xlu2 %v499_v58 }
 0x3f3   :  { %v497_v59 = vpop.f32.mrf.mxu0 }
 0x3f4   :  { %v444_v60 = vpop.xlane.xlu0 %443 }
 0x3f5   :  { %v445_v61 = vsub.f32 %v438_v54, %v444_v60 }
 0x3f7   :  { %v446_v62 = vmul.f32 1.442695, %v445_v61 }
 0x3f9   :  { %1939 = vpow2.f32 %v446_v62 }
 0x3ff   :  { %v1940_v63 = vpop.eup %1939 }
 0x400   :  { %v448_v0 = vsel %vm306_vm6, %v1940_v63, 0.0 }
 0x401   :  { %449 = vadd.xlane.f32.xlu0 %v448_v0 }
 0x415   :  { %586 = vrot.lane.b32.xlu0 %v2445_v32, %s2254_s7 }
 0x41d   :  { %766 = vrot.lane.b32.xlu0 %v711_v44, %s2253_s6 }
 0x460   :  { %v501_v6 = vpop.xlane.xlu2 %500 }
 0x461   :  { %v502_v7 = vsub.f32 %v495_v57, %v501_v6 }
 0x463   :  { %v503_v8 = vmul.f32 1.442695, %v502_v7 }
 0x465   :  { %1941 = vpow2.f32 %v503_v8 }
 0x46b   :  { %v2480_v9 = vpop.eup %1941 }
 0x46c   :  { %v505_v10 = vsel %vm306_vm6, %v2480_v9, 0.0 }
 0x46d   :  { %506 = vadd.xlane.f32.xlu1 %v505_v10 }
 0x474   :  { %v450_v11 = vpop.xlane.xlu0 %449 }
 0x475   :  { %1943 = vrcp.f32 %v450_v11 }
 0x47b   :  { %v1944_v14 = vpop.eup %1943 }
 0x47c   :  { %v452_v15 = vmul.f32 %v1944_v14, %v1940_v63 }
 0x47e   :  { %v453_v16 = vpack.c.bf16 %v452_v15, %v452_v15 }
 0x480   :  { %1770 = vmatmul.msk.bf16.vlgmr.msrb.gmra.mxu3 %vm306_vm6, %v453_v16 }
 0x481   :  { %672 = vmatpush.bf16.xpose.msrb.mxu3 %v663_v17 }
 0x487   :  { %v587_v20 = vpop.permute.xlu0 %586 }
 0x488   :  { %v592_v21 = vsel %vm261_vm5, %v587_v20, 0 }
 0x489   :  { %601 = vmatpush.bf16.xpose.msra.mxu1 %v592_v21 }
 0x48f   :  { %v767_v26 = vpop.permute.xlu0 %766 }
 0x490   :  { %1773 = vmatmul.msk.bf16.vlgmr.msra.gmra.mxu3 %vm261_vm5, %v531_v12  ;;  %1775 = vmatmul.msk.bf16.vlgmr.msra.gmra.mxu1 %vm261_vm5, %v585_v1 }
 0x491   :  { %729 = vmatpush.bf16.xpose.msrb.mxu1 %v720_v19  ;;  %783 = vmatpush.bf16.xpose.msra.mxu3 %v774_v23 }
 0x499   :  { %837 = vmatpush.bf16.xpose.msra.mxu1 %v828_v24 }
 0x4a0   :  { %1777 = vmatmul.msk.bf16.vlgmr.msrb.gmra.mxu3 %vm261_vm5, %v2453_v37  ;;  %1779 = vmatmul.msk.bf16.vlgmr.msrb.gmra.mxu1 %vm261_vm5, %v713_v4 }
 0x4b0   :  { %1781 = vmatmul.msk.bf16.vlgmr.msra.gmra.mxu3 %vm261_vm5, %v767_v26  ;;  %1783 = vmatmul.msk.bf16.vlgmr.msra.gmra.mxu1 %vm261_vm5, %v821_v25 }
 0x4e0   :  { %v507_v57 = vpop.xlane.xlu1 %506 }
 0x503   :  { %v2498_v27 = vpop.f32.mrf.mxu3 }
 0x50b   :  { %v471_v28 = vpop.f32.mrf.mxu3 }
 0x50d   :  { %v603_v29 = vpop.f32.mrf.mxu1 }
 0x50e   :  { %v607_v30 = vsel %vm306_vm6, %v603_v29, -inf }
 0x50f   :  { %608 = vmax.xlane.f32.xlu0 %v607_v30 }
 0x513   :  { %v2501_v31 = vpop.f32.mrf.mxu3 }
 0x514   :  { %v553_v56 = vsel %vm306_vm6, %v2501_v31, -inf }
 0x515   :  { %v605_v33 = vpop.f32.mrf.mxu1 }
 0x51b   :  { %v551_v34 = vpop.f32.mrf.mxu3 }
 0x51d   :  { %v731_v35 = vpop.f32.mrf.mxu1 }
 0x51e   :  { %v735_v36 = vsel %vm306_vm6, %v731_v35, -inf }
 0x51f   :  { %736 = vmax.xlane.f32.xlu2 %v735_v36 }
 0x523   :  { %v2504_v37 = vpop.f32.mrf.mxu3 }
 0x524   :  { %v678_v38 = vsel %vm306_vm6, %v2504_v37, -inf }
 0x525   :  { %679 = vmax.xlane.f32.xlu0 %v678_v38  ;;  %v733_v39 = vpop.f32.mrf.mxu1 }
 0x52b   :  { %v676_v40 = vpop.f32.mrf.mxu3 }
 0x52d   :  { %v839_v41 = vpop.f32.mrf.mxu1 }
 0x52e   :  { %v843_v42 = vsel %vm306_vm6, %v839_v41, -inf }
 0x52f   :  { %844 = vmax.xlane.f32.xlu2 %v843_v42 }
 0x533   :  { %v785_v43 = vpop.f32.mrf.mxu3 }
 0x534   :  { %v789_v44 = vsel %vm306_vm6, %v785_v43, -inf }
 0x535   :  { %v841_v45 = vpop.f32.mrf.mxu1  ;;  %790 = vmax.xlane.f32.xlu0 %v789_v44 }
 0x53b   :  { %v787_v46 = vpop.f32.mrf.mxu3 }
 0x547   :  { %511 = vrot.lane.b32.xlu2 %v2445_v32, %s2256_s12 }
 0x549   :  { %565 = vrot.lane.b32.xlu0 %v2445_v32, %s2257_s23 }
 0x582   :  { %v609_v48 = vpop.xlane.xlu0 %608 }
 0x583   :  { %v610_v49 = vsub.f32 %v603_v29, %v609_v48 }
 0x585   :  { %v611_v50 = vmul.f32 1.442695, %v610_v49 }
 0x587   :  { %1945 = vpow2.f32 %v611_v50 }
 0x58d   :  { %v1946_v51 = vpop.eup %1945 }
 0x58e   :  { %v613_v52 = vsel %vm306_vm6, %v1946_v51, 0.0 }
 0x58f   :  { %614 = vadd.xlane.f32.xlu1 %v613_v52 }
 0x592   :  { %v737_v53 = vpop.xlane.xlu2 %736 }
 0x593   :  { %v738_v54 = vsub.f32 %v731_v35, %v737_v53 }
 0x595   :  { %v739_v55 = vmul.f32 1.442695, %v738_v54 }
 0x597   :  { %1947 = vpow2.f32 %v739_v55  ;;  %554 = vmax.xlane.f32.xlu1 %v553_v56 }
 0x598   :  { %1949 = vrcp.f32 %v507_v57  ;;  %v680_v60 = vpop.xlane.xlu0 %679 }
 0x599   :  { %v681_v17 = vsub.f32 %v2504_v37, %v680_v60 }
 0x59b   :  { %v682_v19 = vmul.f32 1.442695, %v681_v17 }
 0x59d   :  { %v1948_v58 = vpop.eup %1947 }
 0x59e   :  { %v741_v59 = vsel %vm306_vm6, %v1948_v58, 0.0  ;;  %v1950_v62 = vpop.eup %1949 }
 0x59f   :  { %742 = vadd.xlane.f32.xlu2 %v741_v59  ;;  %v509_v63 = vmul.f32 %v1950_v62, %v2480_v9 }
 0x5a1   :  { %v510_v6 = vpack.c.bf16 %v509_v63, %v509_v63 }
 0x5a2   :  { %v845_v61 = vpop.xlane.xlu2 %844 }
 0x5a3   :  { %v846_v10 = vsub.f32 %v839_v41, %v845_v61 }
 0x5a5   :  { %v847_v11 = vmul.f32 1.442695, %v846_v10  ;;  %v1868_v10 = vld [vmem:[%s2763_s8] sm:$0xff] }
 0x5a8   :  { %v791_v0 = vpop.xlane.xlu0 %790 }
 0x5a9   :  { %v792_v1 = vsub.f32 %v785_v43, %v791_v0 }
 0x5aa   :  { %v512_v4 = vpop.permute.xlu2 %511 }
 0x5ab   :  { %v793_v5 = vmul.f32 1.442695, %v792_v1  ;;  %524 = vmatpush.bf16.msra.mxu2 %v512_v4 }
 0x5ad   :  { %1951 = vpow2.f32 %v793_v5  ;;  %v1869_v5 = vld [vmem:[%s2763_s8 + $0x8] sm:$0xff] }
 0x5ae   :  { %1772 = vmatmul.msk.bf16.vlgmr.msra.gmra.mxu2 %vm306_vm6, %v510_v6  ;;  %1953 = vpow2.f32 %v847_v11  ;;  %916 = vmatpush.bf16.msrb.mxu3 %v1869_v5 }
 0x5b0   :  { %619 = vrot.lane.b32.xlu1 %v2445_v32, %s2258_s29 }
 0x5b2   :  { %917 = vmatpush.bf16.msrb.mxu3 %v1868_v10 }
 0x5b3   :  { %v2522_v7 = vpop.eup %1951 }
 0x5b4   :  { %v795_v8 = vsel %vm306_vm6, %v2522_v7, 0.0  ;;  %v1954_v32 = vpop.eup %1953 }
 0x5b5   :  { %796 = vadd.xlane.f32.xlu2 %v795_v8  ;;  %v849_v12 = vsel %vm306_vm6, %v1954_v32, 0.0 }
 0x5b8   :  { %747 = vrot.lane.b32.xlu1 %v2462_v47, %s2256_s12 }
 0x5bb   :  { %v566_v9 = vpop.permute.xlu0 %565 }
 0x5bc   :  { %578 = vmatpush.bf16.msrb.mxu0 %v566_v9 }
 0x5c0   :  { %690 = vrot.lane.b32.xlu1 %v2462_v47, %s2255_s11 }
 0x5cd   :  { %855 = vrot.lane.b32.xlu2 %v2462_v47, %s2258_s29 }
 0x5ea   :  { %850 = vadd.xlane.f32.xlu1 %v849_v12 }
 0x602   :  { %v615_v14 = vpop.xlane.xlu1 %614 }
 0x60a   :  { %v555_v15 = vpop.xlane.xlu1 %554 }
 0x60b   :  { %v556_v16 = vsub.f32 %v2501_v31, %v555_v15 }
 0x60d   :  { %v557_v18 = vmul.f32 1.442695, %v556_v16 }
 0x60f   :  { %1955 = vpow2.f32 %v557_v18 }
 0x610   :  { %1957 = vpow2.f32 %v682_v19 }
 0x611   :  { %1959 = vrcp.f32 %v615_v14 }
 0x612   :  { %v743_v26 = vpop.xlane.xlu2 %742 }
 0x613   :  { %1961 = vrcp.f32 %v743_v26 }
 0x615   :  { %v1956_v20 = vpop.eup %1955 }
 0x616   :  { %v559_v21 = vsel %vm306_vm6, %v1956_v20, 0.0  ;;  %v1958_v22 = vpop.eup %1957 }
 0x617   :  { %560 = vadd.xlane.f32.xlu0 %v559_v21  ;;  %v1960_v23 = vpop.eup %1959  ;;  %v684_v24 = vsel %vm306_vm6, %v1958_v22, 0.0 }
 0x618   :  { %v617_v25 = vmul.f32 %v1960_v23, %v1946_v51 }
 0x619   :  { %v1962_v33 = vpop.eup %1961 }
 0x61a   :  { %v618_v29 = vpack.c.bf16 %v617_v25, %v617_v25  ;;  %v745_v34 = vmul.f32 %v1962_v33, %v1948_v58 }
 0x61c   :  { %v746_v38 = vpack.c.bf16 %v745_v34, %v745_v34 }
 0x61f   :  { %685 = vadd.xlane.f32.xlu0 %v684_v24 }
 0x622   :  { %v620_v28 = vpop.permute.xlu1 %619 }
 0x623   :  { %632 = vmatpush.bf16.msrb.mxu2 %v620_v28  ;;  %v1871_v28 = vld [vmem:[#allocation10 + $0x8] sm:$0xff] }
 0x626   :  { %1776 = vmatmul.msk.bf16.vlgmr.msrb.gmra.mxu2 %vm306_vm6, %v618_v29  ;;  %v1870_v29 = vld [vmem:[#allocation10] sm:$0xff] }
 0x628   :  { %v797_v30 = vpop.xlane.xlu2 %796 }
 0x62a   :  { %v748_v31 = vpop.permute.xlu1 %747 }
 0x62b   :  { %760 = vmatpush.bf16.msra.mxu2 %v748_v31 }
 0x630   :  { %v856_v35 = vpop.permute.xlu2 %855 }
 0x631   :  { %v526_v36 = vpop.f32.mrf.mxu2  ;;  %868 = vmatpush.bf16.msrb.mxu2 %v856_v35 }
 0x632   :  { %v691_v37 = vpop.permute.xlu1 %690 }
 0x633   :  { %801 = vrot.lane.b32.xlu0 %v2462_v47, %s2257_s23  ;;  %703 = vmatpush.bf16.msra.mxu0 %v691_v37 }
 0x636   :  { %1780 = vmatmul.msk.bf16.vlgmr.msra.gmra.mxu2 %vm306_vm6, %v746_v38 }
 0x639   :  { %v528_v39 = vpop.f32.mrf.mxu2 }
 0x65d   :  { %v851_v40 = vpop.xlane.xlu1 %850 }
 0x65e   :  { %1963 = vrcp.f32 %v851_v40 }
 0x664   :  { %v1964_v41 = vpop.eup %1963 }
 0x665   :  { %v853_v42 = vmul.f32 %v1964_v41, %v1954_v32 }
 0x667   :  { %v854_v43 = vpack.c.bf16 %v853_v42, %v853_v42 }
 0x669   :  { %1784 = vmatmul.msk.bf16.vlgmr.msrb.gmra.mxu2 %vm306_vm6, %v854_v43 }
 0x68a   :  { %v561_v44 = vpop.xlane.xlu0 %560 }
 0x68b   :  { %1965 = vrcp.f32 %v561_v44 }
 0x691   :  { %v1966_v45 = vpop.eup %1965 }
 0x692   :  { %v563_v46 = vmul.f32 %v1966_v45, %v1956_v20  ;;  %v686_v49 = vpop.xlane.xlu0 %685  ;;  %v2262_v45 = vmov 32.0  }
 0x693   :  { %1967 = vrcp.f32 %v686_v49 }
 0x694   :  { %v564_v48 = vpack.c.bf16 %v563_v46, %v563_v46  ;;  %1969 = vrcp.f32 %v797_v30 }
 0x695   :  { %1971 = vrcp.f32 %v2262_v45 }
 0x696   :  { %1774 = vmatmul.msk.bf16.vlgmr.msrb.gmra.mxu0 %vm306_vm6, %v564_v48 }
 0x699   :  { %v1968_v47 = vpop.eup %1967 }
 0x69a   :  { %v688_v50 = vmul.f32 %v1968_v47, %v1958_v22  ;;  %v1970_v54 = vpop.eup %1969 }
 0x69b   :  { %v799_v55 = vmul.f32 %v1970_v54, %v2522_v7  ;;  %v1972_v46 = vpop.eup %1971 }
 0x69c   :  { %v689_v51 = vpack.c.bf16 %v688_v50, %v688_v50  ;;  %v970_v48 = vmul.f32 32.0, %v1972_v46  ;;  %vm974_vm9 = vweird.f32 %v1972_v46 }
 0x69d   :  { %v800_v57 = vpack.c.bf16 %v799_v55, %v799_v55 }
 0x69e   :  { %v971_v49 = vsub.f32 1.0, %v970_v48 }
 0x6a5   :  { %v802_v52 = vpop.permute.xlu0 %801 }
 0x6a6   :  { %1778 = vmatmul.msk.bf16.vlgmr.msra.gmra.mxu0 %vm306_vm6, %v689_v51 }
 0x6a7   :  { %814 = vmatpush.bf16.msrb.mxu0 %v802_v52 }
 0x6a9   :  { %v634_v53 = vpop.f32.mrf.mxu2 }
 0x6ab   :  { %950 = vmatpush.bf16.msra.mxu0 %v1871_v28 }
 0x6af   :  { %951 = vmatpush.bf16.msra.mxu0 %v1870_v29 }
 0x6b1   :  { %v636_v56 = vpop.f32.mrf.mxu2 }
 0x6b6   :  { %1782 = vmatmul.msk.bf16.vlgmr.msrb.gmra.mxu0 %vm306_vm6, %v800_v57 }
 0x6b9   :  { %v762_v58 = vpop.f32.mrf.mxu2 }
 0x6ba   :  { %v1909_v59 = vpack.i.bf16 %v762_v58, %v526_v36  ;;  %v960_v36 = vperm.slane %v2404_v13, 7 }
 0x6bc   :  { %1910 = vrot.lane.b32.xlu1 %v1909_v59, %s2259_s24  ;;  %v1873_v59 = vld [vmem:[#allocation11 + $0x8] sm:$0xff] }
 0x6bd   :  { %1047 = vmatpush.bf16.msrb.mxu1 %v1873_v59 }
 0x6c1   :  { %v764_v60 = vpop.f32.mrf.mxu2 }
 0x6ec   :  { %v870_v61 = vpop.f32.mrf.mxu2 }
 0x6ed   :  { %v1919_v62 = vpack.i.bf16 %v870_v61, %v634_v53 }
 0x6ef   :  { %1920 = vrot.lane.b32.xlu2 %v1919_v62, %s2260_s25 }
 0x6f4   :  { %v872_v63 = vpop.f32.mrf.mxu2 }
 0x6f5   :  { %v1872_v63 = vld [vmem:[#allocation11] sm:$0xff] }
 0x6f6   :  { %1048 = vmatpush.bf16.msrb.mxu1 %v1872_v63 }
 0x713   :  { %v580_v0 = vpop.f32.mrf.mxu0 }
 0x71b   :  { %v582_v1 = vpop.f32.mrf.mxu0 }
 0x723   :  { %v705_v4 = vpop.f32.mrf.mxu0 }
 0x72b   :  { %v707_v6 = vpop.f32.mrf.mxu0 }
 0x72e   :  { %v1911_v11 = vpop.permute.xlu1 %1910 }
 0x72f   :  { %v1913_v32 = vunpack.i.h.bf16 %v1911_v11  ;;  %v1912_v12 = vunpack.i.l.bf16 %v1911_v11 }
 0x731   :  { %v886_v18 = vsel %vm261_vm5, %v705_v4, %v1913_v32  ;;  %v650_v19 = vsel %vm261_vm5, %v2498_v27, %v1912_v12  ;;  %v894_v27 = vperm.slane %v2404_v13, 6  ;;  %v972_v13 = vmul.f32 %v1972_v46, %v971_v49 }
 0x733   :  { %v816_v7 = vpop.f32.mrf.mxu0  ;;  %v973_v47 = vadd.f32 %v1972_v46, %v972_v13 }
 0x734   :  { %v1914_v8 = vpack.i.bf16 %v816_v7, %v580_v0 }
 0x736   :  { %1915 = vrot.lane.b32.xlu0 %v1914_v8, %s2261_s27 }
 0x73b   :  { %v818_v9 = vpop.f32.mrf.mxu0 }
 0x749   :  { %v1921_v14 = vpop.permute.xlu2 %1920 }
 0x74a   :  { %v1923_v20 = vunpack.i.h.bf16 %v1921_v14  ;;  %v1922_v21 = vunpack.i.l.bf16 %v1921_v14  ;;  %v2581_v14 = vld [vmem:[%s2769_s14 + $0x8] sm:$0xff]  ;;  %s2263_s14 = smov 56  }
 0x7a8   :  { %v1916_v15 = vpop.permute.xlu0 %1915 }
 0x7a9   :  { %v1918_v16 = vunpack.i.h.bf16 %v1916_v15  ;;  %v1917_v17 = vunpack.i.l.bf16 %v1916_v15 }
 0x7ab   :  { %v651_v22 = vsel %vm306_vm6, %v650_v19, %v1917_v17  ;;  %v887_v23 = vsel %vm306_vm6, %v886_v18, %v1918_v16  ;;  %v1014_v18 = vperm.slane %v2581_v14, 0 }
 0x7ac   :  { %v653_v24 = vsel %vm652_vm8, %v651_v22, %v1922_v21  ;;  %v888_v25 = vsel %vm652_vm8, %v887_v23, %v1923_v20  ;;  %v1017_v22 = vperm.slane %v2581_v14, 1 }
 0x7ad   :  { %v889_v26 = vpack.c.bf16 %v888_v25, %v653_v24 }
 0x7af   :  { %1793 = vmatmul.msk.bf16.vlgmr.msrb.gmra.mxu3 %vm352_vm7, %v889_v26 }
 0x832   :  { %v919_v30 = vpop.f32.mrf.mxu3 }
 0x833   :  { %v920_v33 = vadd.f32 %v919_v30, %v894_v27  ;;  %v1025_v30 = vperm.slane %v2581_v14, 2 }
 0x83a   :  { %v921_v31 = vpop.f32.mrf.mxu3 }
 0x83b   :  { %v922_v34 = vadd.f32 %v921_v31, %v894_v27 }
 0x83d   :  { %v924_v35 = vpack.c.bf16 %v922_v34, %v920_v33 }
 0x83f   :  { %1802 = vmatmul.msk.bf16.vlgmr.msra.gmra.mxu0 %vm352_vm7, %v924_v35 }
 0x8bc   :  { %v953_v37 = vpop.f32.mrf.mxu0 }
 0x8bd   :  { %v958_v38 = vadd.f32 %v953_v37, %v2429_v2  ;;  %v2570_v2 = vsel %vm974_vm9, %v1972_v46, %v973_v47 }
 0x8bf   :  { %v961_v39 = vadd.f32 %v960_v36, %v958_v38 }
 0x8c1   :  { %v963_v40 = vsel %vm352_vm7, %v961_v39, 0.0 }
 0x8c2   :  { %964 = vadd.xlane.f32.xlu0 %v963_v40 }
 0x8c4   :  { %v955_v41 = vpop.f32.mrf.mxu0 }
 0x8c5   :  { %v959_v42 = vadd.f32 %v955_v41, %v2434_v3 }
 0x8c7   :  { %v962_v43 = vadd.f32 %v960_v36, %v959_v42 }
 0x8c9   :  { %v966_v44 = vsel %vm352_vm7, %v962_v43, 0.0 }
 0x8ca   :  { %967 = vadd.xlane.f32.xlu2 %v966_v44 }
 0x935   :  { %v965_v50 = vpop.xlane.xlu0 %964 }
 0x936   :  { %v976_v51 = vmul.f32 %v2570_v2, %v965_v50 }
 0x938   :  { %v978_v52 = vsub.f32 %v961_v39, %v976_v51 }
 0x93a   :  { %v980_v53 = vmul.f32 %v978_v52, %v978_v52 }
 0x93c   :  { %v982_v3 = vsel %vm352_vm7, %v980_v53, 0.0 }
 0x93d   :  { %983 = vadd.xlane.f32.xlu1 %v982_v3  ;;  %v968_v54 = vpop.xlane.xlu2 %967 }
 0x93e   :  { %v977_v55 = vmul.f32 %v2570_v2, %v968_v54 }
 0x940   :  { %v979_v56 = vsub.f32 %v962_v43, %v977_v55 }
 0x942   :  { %v981_v57 = vmul.f32 %v979_v56, %v979_v56 }
 0x944   :  { %v985_v58 = vsel %vm352_vm7, %v981_v57, 0.0 }
 0x945   :  { %986 = vadd.xlane.f32.xlu0 %v985_v58 }
 0x9b0   :  { %v984_v60 = vpop.xlane.xlu1 %983 }
 0x9b1   :  { %v988_v61 = vmul.f32 %v984_v60, %v2570_v2 }
 0x9b3   :  { %v990_v62 = vadd.f32 1e-05, %v988_v61 }
 0x9b5   :  { %1973 = vrsqrt.f32 %v990_v62  ;;  %vm998_vm11 = vweird.f32 %v990_v62 }
 0x9b8   :  { %v987_v0 = vpop.xlane.xlu0 %986 }
 0x9b9   :  { %v989_v1 = vmul.f32 %v987_v0, %v2570_v2 }
 0x9bb   :  { %v1974_v4 = vpop.eup %1973  ;;  %v991_v5 = vadd.f32 1e-05, %v989_v1 }
 0x9bc   :  { %v993_v6 = vmul.f32 %v1974_v4, %v990_v62  ;;  %vm999_vm10 = vweird.f32 %v1974_v4 }
 0x9bd   :  { %1975 = vrsqrt.f32 %v991_v5  ;;  %vm1000_vm12 = vmor %vm998_vm11, %vm999_vm10  ;;  %vm1008_vm14 = vweird.f32 %v991_v5 }
 0x9be   :  { %v994_v7 = vmul.f32 %v1974_v4, %v993_v6 }
 0x9c0   :  { %v995_v8 = vmul.f32 0.5, %v994_v7 }
 0x9c2   :  { %v996_v9 = vsub.f32 1.5, %v995_v8 }
 0x9c3   :  { %v1976_v10 = vpop.eup %1975 }
 0x9c4   :  { %v997_v11 = vmul.f32 %v1974_v4, %v996_v9  ;;  %v1003_v32 = vmul.f32 %v1976_v10, %v991_v5  ;;  %vm1009_vm13 = vweird.f32 %v1976_v10 }
 0x9c5   :  { %vm1010_vm15 = vmor %vm1008_vm14, %vm1009_vm13 }
 0x9c6   :  { %v1004_v12 = vmul.f32 %v1976_v10, %v1003_v32  ;;  %v1001_v15 = vsel %vm1000_vm12, %v1974_v4, %v997_v11 }
 0x9c7   :  { %v1012_v19 = vmul.f32 %v1001_v15, %v978_v52 }
 0x9c8   :  { %v1005_v16 = vmul.f32 0.5, %v1004_v12 }
 0x9c9   :  { %v1015_v23 = vmul.f32 %v1014_v18, %v1012_v19 }
 0x9ca   :  { %v1006_v17 = vsub.f32 1.5, %v1005_v16 }
 0x9cb   :  { %v2585_v26 = vadd.f32 %v1017_v22, %v1015_v23 }
 0x9cc   :  { %v1007_v20 = vmul.f32 %v1976_v10, %v1006_v17 }
 0x9ce   :  { %v1011_v21 = vsel %vm1010_vm15, %v1976_v10, %v1007_v20 }
 0x9cf   :  { %v1013_v24 = vmul.f32 %v1011_v21, %v979_v56 }
 0x9d1   :  { %v1016_v25 = vmul.f32 %v1014_v18, %v1013_v24 }
 0x9d3   :  { %v2587_v28 = vadd.f32 %v1017_v22, %v1016_v25 }
 0x9d5   :  { %v1020_v29 = vpack.c.bf16 %v2587_v28, %v2585_v26 }
 0x9d7   :  { %1811 = vmatmul.msk.bf16.vlgmr.msrb.gmra.mxu1 %vm352_vm7, %v1020_v29 }
 0xa54   :  { %v1050_v27 = vpop.f32.mrf.mxu1 }
 0xa55   :  { %v1051_v31 = vadd.f32 %v1050_v27, %v1025_v30 }
 0xa57   :  { %v1055_v33 = vpack.c.bf16 %v1051_v31, %v1051_v31 }
 0xa59   :  { %v1058_v34 = vunpack.c.l.b16 %v1055_v33 }
 0xa5b   :  { %v2593_v35 = vpack.c.b16 %v1058_v34, %v1058_v34 }
 0xa5c   :  { %v1052_v36 = vpop.f32.mrf.mxu1 }
 0xa5d   :  { %1172 = vrot.lane.b32.xlu1 %v2593_v35, %s2257_s23  ;;  %1116 = vrot.lane.b32.xlu0 %v2593_v35, %s2256_s12  ;;  %v1053_v37 = vadd.f32 %v1052_v36, %v1025_v30 }
 0xa5e   :  { %1060 = vrot.lane.b32.xlu2 %v2593_v35, %s2255_s11 }
 0xa5f   :  { %v1056_v38 = vpack.c.bf16 %v1053_v37, %v1053_v37 }
 0xa61   :  { %v1298_v39 = vunpack.c.l.b16 %v1056_v38 }
 0xa63   :  { %v2607_v40 = vpack.c.b16 %v1298_v39, %v1298_v39 }
 0xa65   :  { %1226 = vrot.lane.b32.xlu1 %v2593_v35, %s2254_s7  ;;  %1170 = vrot.lane.b32.xlu0 %v2593_v35, %s2253_s6 }
 0xa66   :  { %1114 = vrot.lane.b32.xlu2 %v2593_v35, %s2252_s0 }
 0xa6d   :  { %1354 = vrot.lane.b32.xlu1 %v2607_v40, %s2252_s0  ;;  %1300 = vrot.lane.b32.xlu0 %v2607_v40, %s2255_s11 }
 0xa6e   :  { %1228 = vrot.lane.b32.xlu2 %v2593_v35, %s2258_s29 }
 0xa75   :  { %1466 = vrot.lane.b32.xlu1 %v2607_v40, %s2254_s7  ;;  %1412 = vrot.lane.b32.xlu0 %v2607_v40, %s2257_s23  ;;  %s2267_s7 = smov 128  }
 0xa76   :  { %1356 = vrot.lane.b32.xlu2 %v2607_v40, %s2256_s12 }
 0xa7d   :  { %1468 = vrot.lane.b32.xlu0 %v2607_v40, %s2258_s29 }
 0xa7e   :  { %1410 = vrot.lane.b32.xlu2 %v2607_v40, %s2253_s6  ;;  %s1721_s6 = sshll.u32 %s2770_s15, 4  ;;  %s1722_s6 = int_to_ptr.hbm [resolvable:$true] %s1721_s6 }
 0xa85   :  { %1093 = vrot.lane.b32.xlu0 %v2593_v35, %s2243_s28 }
 0xab8   :  { %v1061_v41 = vpop.permute.xlu2 %1060 }
 0xab9   :  { %v1066_v42 = vsel %vm261_vm5, %v1061_v41, 0 }
 0xaba   :  { %1075 = vmatpush.bf16.xpose.msra.mxu2 %v1066_v42 }
 0xac0   :  { %v1115_v43 = vpop.permute.xlu2 %1114 }
 0xac1   :  { %1812 = vmatmul.msk.bf16.vlgmr.msra.gmra.mxu2 %vm261_vm5, %v1055_v33 }
 0xac8   :  { %v1229_v44 = vpop.permute.xlu2 %1228 }
 0xac9   :  { %v1234_v13 = vsel %vm261_vm5, %v1229_v44, 0 }
 0xacf   :  { %v1173_v45 = vpop.permute.xlu1 %1172  ;;  %v1117_v46 = vpop.permute.xlu0 %1116 }
 0xad0   :  { %v1178_v48 = vsel %vm261_vm5, %v1173_v45, 0  ;;  %v1122_v49 = vsel %vm261_vm5, %v1117_v46, 0  ;;  %v1357_v47 = vpop.permute.xlu2 %1356 }
 0xad1   :  { %1131 = vmatpush.bf16.xpose.msrb.mxu0 %v1122_v49  ;;  %1187 = vmatpush.bf16.xpose.msrb.mxu2 %v1178_v48  ;;  %v1362_v51 = vsel %vm261_vm5, %v1357_v47, 0 }
 0xad7   :  { %v1171_v50 = vpop.permute.xlu0 %1170  ;;  %v1227_v3 = vpop.permute.xlu1 %1226 }
 0xad8   :  { %1814 = vmatmul.msk.bf16.vlgmr.msrb.gmra.mxu0 %vm261_vm5, %v1115_v43  ;;  %1816 = vmatmul.msk.bf16.vlgmr.msrb.gmra.mxu2 %vm261_vm5, %v1171_v50  ;;  %v1411_v58 = vpop.permute.xlu2 %1410 }
 0xad9   :  { %1243 = vmatpush.bf16.xpose.msra.mxu0 %v1234_v13 }
 0xadf   :  { %v1301_v52 = vpop.permute.xlu0 %1300  ;;  %v1355_v59 = vpop.permute.xlu1 %1354 }
 0xae0   :  { %v1306_v53 = vsel %vm261_vm5, %v1301_v52, 0 }
 0xae1   :  { %1371 = vmatpush.bf16.xpose.msrb.mxu0 %v1362_v51  ;;  %1315 = vmatpush.bf16.xpose.msra.mxu2 %v1306_v53 }
 0xae7   :  { %v1413_v54 = vpop.permute.xlu0 %1412  ;;  %v1467_v62 = vpop.permute.xlu1 %1466 }
 0xae8   :  { %v1418_v55 = vsel %vm261_vm5, %v1413_v54, 0  ;;  %1818 = vmatmul.msk.bf16.vlgmr.msra.gmra.mxu0 %vm261_vm5, %v1227_v3  ;;  %1820 = vmatmul.msk.bf16.vlgmr.msra.gmra.mxu2 %vm261_vm5, %v1056_v38 }
 0xae9   :  { %1427 = vmatpush.bf16.xpose.msrb.mxu2 %v1418_v55 }
 0xaef   :  { %v1469_v56 = vpop.permute.xlu0 %1468 }
 0xaf0   :  { %v1474_v57 = vsel %vm261_vm5, %v1469_v56, 0 }
 0xaf1   :  { %1483 = vmatpush.bf16.xpose.msra.mxu0 %v1474_v57 }
 0xaf7   :  { %v1094_v60 = vpop.permute.xlu0 %1093 }
 0xaf8   :  { %v1099_v61 = vsel %vm268_vm4, %v1094_v60, 0  ;;  %1822 = vmatmul.msk.bf16.vlgmr.msrb.gmra.mxu0 %vm261_vm5, %v1355_v59  ;;  %1824 = vmatmul.msk.bf16.vlgmr.msrb.gmra.mxu2 %vm261_vm5, %v1411_v58 }
 0xaf9   :  { %1108 = vmatpush.bf16.msra.mxu3 %v1099_v61 }
 0xb08   :  { %1826 = vmatmul.msk.bf16.vlgmr.msra.gmra.mxu0 %vm261_vm5, %v1467_v62 }
 0xb44   :  { %v1077_v63 = vpop.f32.mrf.mxu2 }
 0xb45   :  { %v1081_v0 = vsel %vm261_vm5, %v1077_v63, -inf }
 0xb46   :  { %1082 = vmax.xlane.f32.xlu2 %v1081_v0 }
 0xb4c   :  { %v1079_v1 = vpop.f32.mrf.mxu2 }
 0xb55   :  { %v1133_v4 = vpop.f32.mrf.mxu0 }
 0xb56   :  { %v1137_v5 = vsel %vm261_vm5, %v1133_v4, -inf }
 0xb57   :  { %1138 = vmax.xlane.f32.xlu0 %v1137_v5 }
 0xb5b   :  { %v2646_v6 = vpop.f32.mrf.mxu2 }
 0xb5c   :  { %v1193_v7 = vsel %vm261_vm5, %v2646_v6, -inf }
 0xb5d   :  { %v1135_v8 = vpop.f32.mrf.mxu0  ;;  %1194 = vmax.xlane.f32.xlu1 %v1193_v7 }
 0xb63   :  { %v1191_v9 = vpop.f32.mrf.mxu2 }
 0xb65   :  { %v2650_v10 = vpop.f32.mrf.mxu0 }
 0xb66   :  { %v1249_v11 = vsel %vm261_vm5, %v2650_v10, -inf }
 0xb67   :  { %1250 = vmax.xlane.f32.xlu2 %v1249_v11 }
 0xb6b   :  { %v1317_v32 = vpop.f32.mrf.mxu2 }
 0xb6c   :  { %v1321_v12 = vsel %vm261_vm5, %v1317_v32, -inf }
 0xb6d   :  { %v1247_v15 = vpop.f32.mrf.mxu0  ;;  %1322 = vmax.xlane.f32.xlu0 %v1321_v12 }
 0xb73   :  { %v1319_v16 = vpop.f32.mrf.mxu2 }
 0xb75   :  { %v1373_v17 = vpop.f32.mrf.mxu0 }
 0xb76   :  { %v1377_v18 = vsel %vm261_vm5, %v1373_v17, -inf }
 0xb77   :  { %1378 = vmax.xlane.f32.xlu1 %v1377_v18 }
 0xb7b   :  { %v2656_v19 = vpop.f32.mrf.mxu2 }
 0xb7c   :  { %v1433_v20 = vsel %vm261_vm5, %v2656_v19, -inf }
 0xb7d   :  { %v1375_v21 = vpop.f32.mrf.mxu0  ;;  %1434 = vmax.xlane.f32.xlu2 %v1433_v20 }
 0xb83   :  { %v1431_v22 = vpop.f32.mrf.mxu2 }
 0xb85   :  { %v1485_v23 = vpop.f32.mrf.mxu0 }
 0xb86   :  { %v1489_v24 = vsel %vm261_vm5, %v1485_v23, -inf }
 0xb87   :  { %1490 = vmax.xlane.f32.xlu1 %v1489_v24 }
 0xb8d   :  { %v1487_v25 = vpop.f32.mrf.mxu0 }
 0xba0   :  { %1149 = vrot.lane.b32.xlu1 %v2593_v35, %s2263_s14 }
 0xbb9   :  { %v1083_v29 = vpop.xlane.xlu2 %1082 }
 0xbba   :  { %v1084_v30 = vsub.f32 %v1077_v63, %v1083_v29 }
 0xbbc   :  { %v1085_v27 = vmul.f32 1.442695, %v1084_v30 }
 0xbbe   :  { %1977 = vpow2.f32 %v1085_v27 }
 0xbc4   :  { %v1978_v31 = vpop.eup %1977 }
 0xbc5   :  { %v1087_v33 = vsel %vm261_vm5, %v1978_v31, 0.0 }
 0xbc6   :  { %1088 = vadd.xlane.f32.xlu0 %v1087_v33 }
 0xbca   :  { %v1139_v34 = vpop.xlane.xlu0 %1138 }
 0xbcb   :  { %v1140_v36 = vsub.f32 %v1133_v4, %v1139_v34 }
 0xbcd   :  { %v1141_v37 = vmul.f32 1.442695, %v1140_v36 }
 0xbcf   :  { %1979 = vpow2.f32 %v1141_v37 }
 0xbd0   :  { %v1195_v41 = vpop.xlane.xlu1 %1194 }
 0xbd1   :  { %v1196_v59 = vsub.f32 %v2646_v6, %v1195_v41 }
 0xbd3   :  { %v1197_v60 = vmul.f32 1.442695, %v1196_v59 }
 0xbd5   :  { %v1980_v38 = vpop.eup %1979 }
 0xbd6   :  { %v1143_v39 = vsel %vm261_vm5, %v1980_v38, 0.0 }
 0xbd7   :  { %1144 = vadd.xlane.f32.xlu2 %v1143_v39 }
 0xbda   :  { %1205 = vrot.lane.b32.xlu0 %v2593_v35, %s2264_s30  ;;  %v1251_v3 = vpop.xlane.xlu2 %1250 }
 0xbdb   :  { %v1252_v55 = vsub.f32 %v2650_v10, %v1251_v3 }
 0xbdd   :  { %v1253_v56 = vmul.f32 1.442695, %v1252_v55 }
 0xbe0   :  { %v1323_v45 = vpop.xlane.xlu0 %1322 }
 0xbe1   :  { %v1324_v46 = vsub.f32 %v1317_v32, %v1323_v45 }
 0xbe3   :  { %v1325_v49 = vmul.f32 1.442695, %v1324_v46 }
 0xbea   :  { %v1379_v42 = vpop.xlane.xlu1 %1378 }
 0xbeb   :  { %v1380_v43 = vsub.f32 %v1373_v17, %v1379_v42 }
 0xbed   :  { %v1381_v44 = vmul.f32 1.442695, %v1380_v43 }
 0xbef   :  { %1981 = vpow2.f32 %v1381_v44  ;;  %1261 = vrot.lane.b32.xlu2 %v2593_v35, %s2265_s16 }
 0xbf0   :  { %1983 = vpow2.f32 %v1325_v49  ;;  %v1435_v6 = vpop.xlane.xlu2 %1434 }
 0xbf5   :  { %v2668_v48 = vpop.eup %1981 }
 0xbf6   :  { %v1383_v13 = vsel %vm261_vm5, %v2668_v48, 0.0  ;;  %v2674_v52 = vpop.eup %1983 }
 0xbf7   :  { %1384 = vadd.xlane.f32.xlu1 %v1383_v13  ;;  %1333 = vrot.lane.b32.xlu2 %v2607_v40, %s2243_s28  ;;  %v1327_v35 = vsel %vm261_vm5, %v2674_v52, 0.0 }
 0xbfa   :  { %v1491_v47 = vpop.xlane.xlu1 %1490 }
 0xbfb   :  { %v1492_v50 = vsub.f32 %v1485_v23, %v1491_v47 }
 0xbfd   :  { %v1493_v51 = vmul.f32 1.442695, %v1492_v50 }
 0xbff   :  { %1985 = vpow2.f32 %v1493_v51 }
 0xc00   :  { %1987 = vpow2.f32 %v1253_v56 }
 0xc01   :  { %1989 = vpow2.f32 %v1197_v60 }
 0xc04   :  { %1328 = vadd.xlane.f32.xlu0 %v1327_v35 }
 0xc05   :  { %v2678_v53 = vpop.eup %1985 }
 0xc06   :  { %v1495_v54 = vsel %vm261_vm5, %v2678_v53, 0.0  ;;  %v1988_v61 = vpop.eup %1987 }
 0xc07   :  { %v1255_v62 = vsel %vm261_vm5, %v1988_v61, 0.0  ;;  %v1990_v63 = vpop.eup %1989 }
 0xc08   :  { %v1199_v0 = vsel %vm261_vm5, %v1990_v63, 0.0 }
 0xc0c   :  { %1496 = vadd.xlane.f32.xlu0 %v1495_v54 }
 0xc10   :  { %1445 = vrot.lane.b32.xlu1 %v2607_v40, %s2264_s30 }
 0xc12   :  { %v1150_v57 = vpop.permute.xlu1 %1149 }
 0xc13   :  { %v1155_v58 = vsel %vm268_vm4, %v1150_v57, 0 }
 0xc14   :  { %1164 = vmatpush.bf16.msra.mxu1 %v1155_v58 }
 0xc20   :  { %1501 = vrot.lane.b32.xlu0 %v2607_v40, %s2265_s16  ;;  %1256 = vadd.xlane.f32.xlu2 %v1255_v62 }
 0xc28   :  { %1200 = vadd.xlane.f32.xlu2 %v1199_v0 }
 0xc39   :  { %v1089_v1 = vpop.xlane.xlu0 %1088 }
 0xc3a   :  { %1991 = vrcp.f32 %v1089_v1 }
 0xc40   :  { %v1992_v4 = vpop.eup %1991  ;;  %1389 = vrot.lane.b32.xlu2 %v2607_v40, %s2263_s14  ;;  %v1436_v40 = vsub.f32 %v2656_v19, %v1435_v6 }
 0xc41   :  { %v1091_v5 = vmul.f32 %v1992_v4, %v1978_v31 }
 0xc42   :  { %v1437_v18 = vmul.f32 1.442695, %v1436_v40 }
 0xc43   :  { %v1092_v7 = vpack.c.bf16 %v1091_v5, %v1091_v5 }
 0xc45   :  { %1813 = vmatmul.msk.bf16.vlgmr.msra.gmra.mxu3 %vm261_vm5, %v1092_v7 }
 0xc4a   :  { %v1145_v8 = vpop.xlane.xlu2 %1144 }
 0xc4b   :  { %1993 = vrcp.f32 %v1145_v8 }
 0xc4c   :  { %v1206_v9 = vpop.permute.xlu0 %1205  ;;  %1995 = vpow2.f32 %v1437_v18 }
 0xc4d   :  { %v1211_v10 = vsel %vm268_vm4, %v1206_v9, 0 }
 0xc4e   :  { %1220 = vmatpush.bf16.msrb.mxu3 %v1211_v10 }
 0xc51   :  { %v1994_v11 = vpop.eup %1993 }
 0xc52   :  { %v1147_v32 = vmul.f32 %v1994_v11, %v1980_v38  ;;  %v1262_v12 = vpop.permute.xlu2 %1261  ;;  %v1996_v21 = vpop.eup %1995  ;;  %v1875_v11 = vld [vmem:[#allocation13 + $0x8] sm:$0xff] }
 0xc53   :  { %v1267_v15 = vsel %vm268_vm4, %v1262_v12, 0  ;;  %v1439_v22 = vsel %vm261_vm5, %v1996_v21, 0.0  ;;  %1564 = vmatpush.bf16.msra.mxu2 %v1875_v11 }
 0xc54   :  { %v1148_v16 = vpack.c.bf16 %v1147_v32, %v1147_v32  ;;  %1276 = vmatpush.bf16.msrb.mxu1 %v1267_v15  ;;  %v1874_v32 = vld [vmem:[#allocation13] sm:$0xff] }
 0xc56   :  { %1815 = vmatmul.msk.bf16.vlgmr.msra.gmra.mxu1 %vm261_vm5, %v1148_v16 }
 0xc57   :  { %1565 = vmatpush.bf16.msra.mxu2 %v1874_v32 }
 0xc5a   :  { %v1334_v17 = vpop.permute.xlu2 %1333 }
 0xc5b   :  { %v1339_v20 = vsel %vm268_vm4, %v1334_v17, 0 }
 0xc5c   :  { %1348 = vmatpush.bf16.msra.mxu3 %v1339_v20 }
 0xc69   :  { %1440 = vadd.xlane.f32.xlu2 %v1439_v22 }
 0xc6a   :  { %v1385_v31 = vpop.xlane.xlu1 %1384 }
 0xc77   :  { %v1329_v23 = vpop.xlane.xlu0 %1328 }
 0xc7f   :  { %v1497_v29 = vpop.xlane.xlu0 %1496 }
 0xc82   :  { %v1446_v38 = vpop.permute.xlu1 %1445 }
 0xc83   :  { %v1451_v44 = vsel %vm268_vm4, %v1446_v38, 0 }
 0xc92   :  { %v1502_v34 = vpop.permute.xlu0 %1501 }
 0xc93   :  { %v1257_v24 = vpop.xlane.xlu2 %1256  ;;  %v1507_v41 = vsel %vm268_vm4, %v1502_v34, 0 }
 0xc94   :  { %1997 = vrcp.f32 %v1257_v24 }
 0xc9a   :  { %v1998_v25 = vpop.eup %1997 }
 0xc9b   :  { %v1259_v30 = vmul.f32 %v1998_v25, %v1988_v61  ;;  %v1201_v27 = vpop.xlane.xlu2 %1200 }
 0xc9c   :  { %1999 = vrcp.f32 %v1201_v27 }
 0xc9d   :  { %v1260_v19 = vpack.c.bf16 %v1259_v30, %v1259_v30  ;;  %2001 = vrcp.f32 %v1385_v31 }
 0xc9e   :  { %2003 = vrcp.f32 %v1329_v23 }
 0xc9f   :  { %1819 = vmatmul.msk.bf16.vlgmr.msrb.gmra.mxu1 %vm261_vm5, %v1260_v19  ;;  %2005 = vrcp.f32 %v1497_v29  ;;  %v1877_v19 = vld [vmem:[#allocation14 + $0x8] sm:$0xff] }
 0xca2   :  { %v2000_v33 = vpop.eup %1999 }
 0xca3   :  { %v1203_v36 = vmul.f32 %v2000_v33, %v1990_v63  ;;  %v1390_v37 = vpop.permute.xlu2 %1389  ;;  %v2002_v43 = vpop.eup %2001  ;;  %v1876_v33 = vld [vmem:[#allocation14] sm:$0xff] }
 0xca4   :  { %v1395_v39 = vsel %vm268_vm4, %v1390_v37, 0  ;;  %v1387_v45 = vmul.f32 %v2002_v43, %v2668_v48  ;;  %v2004_v49 = vpop.eup %2003  ;;  %v1880_v43 = vld [vmem:[%s2768_s13 + $0x10] sm:$0xff] }
 0xca5   :  { %v1204_v42 = vpack.c.bf16 %v1203_v36, %v1203_v36  ;;  %1404 = vmatpush.bf16.msra.mxu1 %v1395_v39  ;;  %v1331_v13 = vmul.f32 %v2004_v49, %v2674_v52  ;;  %v2006_v50 = vpop.eup %2005  ;;  %v1542_v36 = vperm.slane %v2581_v14, 3  ;;  %v1577_v49 = vperm.slane %v2581_v14, 4 }
 0xca6   :  { %v1388_v46 = vpack.c.bf16 %v1387_v45, %v1387_v45  ;;  %v1499_v51 = vmul.f32 %v2006_v50, %v2678_v53  ;;  %v1878_v45 = vld [vmem:[%s2768_s13] sm:$0xff] }
 0xca7   :  { %1817 = vmatmul.msk.bf16.vlgmr.msrb.gmra.mxu3 %vm261_vm5, %v1204_v42  ;;  %v1332_v47 = vpack.c.bf16 %v1331_v13, %v1331_v13  ;;  %v1881_v42 = vld [vmem:[%s2768_s13 + $0x18] sm:$0xff] }
 0xca8   :  { %1460 = vmatpush.bf16.msrb.mxu3 %v1451_v44  ;;  %v1500_v35 = vpack.c.bf16 %v1499_v51, %v1499_v51  ;;  %1651 = vmatpush.bf16.msrb.mxu0 %v1881_v42  ;;  %v1879_v44 = vld [vmem:[%s2768_s13 + $0x8] sm:$0xff]  ;;  %s2266_s13 = smov [#allocation16]  }
 0xca9   :  { %1516 = vmatpush.bf16.msrb.mxu1 %v1507_v41  ;;  %s1719_s21 = sshll.u32 %s2266_s13, 4  ;;  %s1720_s21 = int_to_ptr.vmem [resolvable:$true] %s1719_s21 }
 0xcac   :  { %1652 = vmatpush.bf16.msrb.mxu0 %v1880_v43 }
 0xcaf   :  { %1823 = vmatmul.msk.bf16.vlgmr.msra.gmra.mxu1 %vm261_vm5, %v1388_v46 }
 0xcb0   :  { %1653 = vmatpush.bf16.msrb.mxu0 %v1879_v44 }
 0xcb4   :  { %1654 = vmatpush.bf16.msrb.mxu0 %v1878_v45 }
 0xcb7   :  { %1821 = vmatmul.msk.bf16.vlgmr.msra.gmra.mxu3 %vm261_vm5, %v1332_v47 }
 0xcb8   :  { %1599 = vmatpush.bf16.msra.mxu3 %v1877_v19 }
 0xcbc   :  { %1600 = vmatpush.bf16.msra.mxu3 %v1876_v33 }
 0xcbf   :  { %1827 = vmatmul.msk.bf16.vlgmr.msrb.gmra.mxu1 %vm261_vm5, %v1500_v35 }
 0xcc8   :  { %v1110_v3 = vpop.f32.mrf.mxu3 }
 0xcd0   :  { %v1112_v54 = vpop.f32.mrf.mxu3 }
 0xcd1   :  { %v1618_v54 = vperm.slane %v2581_v14, 5 }
 0xcd3   :  { %v1166_v55 = vpop.f32.mrf.mxu1 }
 0xcdb   :  { %v1168_v48 = vpop.f32.mrf.mxu1 }
 0xcdc   :  { %v1441_v56 = vpop.xlane.xlu2 %1440 }
 0xcdd   :  { %2007 = vrcp.f32 %v1441_v56 }
 0xce3   :  { %v2008_v57 = vpop.eup %2007 }
 0xce4   :  { %v1443_v58 = vmul.f32 %v2008_v57, %v1996_v21 }
 0xce6   :  { %v1444_v59 = vpack.c.bf16 %v1443_v58, %v1443_v58 }
 0xce8   :  { %1825 = vmatmul.msk.bf16.vlgmr.msrb.gmra.mxu3 %vm261_vm5, %v1444_v59 }
 0xd1c   :  { %v1278_v52 = vpop.f32.mrf.mxu1 }
 0xd24   :  { %v1280_v60 = vpop.f32.mrf.mxu1 }
 0xd2a   :  { %v1222_v61 = vpop.f32.mrf.mxu3 }
 0xd2c   :  { %v1406_v62 = vpop.f32.mrf.mxu1 }
 0xd2d   :  { %v1924_v63 = vpack.i.bf16 %v1406_v62, %v1166_v55 }
 0xd2f   :  { %1925 = vrot.lane.b32.xlu1 %v1924_v63, %s2259_s24 }
 0xd32   :  { %v1224_v53 = vpop.f32.mrf.mxu3 }
 0xd34   :  { %v1408_v0 = vpop.f32.mrf.mxu1 }
 0xd3a   :  { %v1350_v1 = vpop.f32.mrf.mxu3 }
 0xd3c   :  { %v1518_v4 = vpop.f32.mrf.mxu1 }
 0xd3d   :  { %v1934_v5 = vpack.i.bf16 %v1518_v4, %v1278_v52 }
 0xd3f   :  { %1935 = vrot.lane.b32.xlu2 %v1934_v5, %s2260_s25 }
 0xd42   :  { %v1352_v6 = vpop.f32.mrf.mxu3 }
 0xd44   :  { %v1520_v7 = vpop.f32.mrf.mxu1 }
 0xd6b   :  { %v1462_v8 = vpop.f32.mrf.mxu3 }
 0xd6c   :  { %v1929_v9 = vpack.i.bf16 %v1462_v8, %v1222_v61 }
 0xd6e   :  { %1930 = vrot.lane.b32.xlu0 %v1929_v9, %s2261_s27 }
 0xd73   :  { %v1464_v10 = vpop.f32.mrf.mxu3 }
 0xd99   :  { %v1936_v40 = vpop.permute.xlu2 %1935 }
 0xd9a   :  { %v1938_v21 = vunpack.i.h.bf16 %v1936_v40  ;;  %v1937_v22 = vunpack.i.l.bf16 %v1936_v40 }
 0xda1   :  { %v1926_v12 = vpop.permute.xlu1 %1925 }
 0xda2   :  { %v1928_v15 = vunpack.i.h.bf16 %v1926_v12  ;;  %v1927_v16 = vunpack.i.l.bf16 %v1926_v12 }
 0xda4   :  { %v1534_v23 = vsel %vm261_vm5, %v1350_v1, %v1928_v15  ;;  %v1294_v24 = vsel %vm261_vm5, %v1110_v3, %v1927_v16 }
 0xde0   :  { %v1931_v17 = vpop.permute.xlu0 %1930 }
 0xde1   :  { %v1933_v18 = vunpack.i.h.bf16 %v1931_v17  ;;  %v1932_v20 = vunpack.i.l.bf16 %v1931_v17 }
 0xde3   :  { %v1535_v25 = vsel %vm306_vm6, %v1534_v23, %v1933_v18  ;;  %v1295_v29 = vsel %vm306_vm6, %v1294_v24, %v1932_v20  ;;  %v1710_v24 = vperm.slane %v2581_v14, 7 }
 0xde4   :  { %v1296_v30 = vsel %vm652_vm8, %v1295_v29, %v1937_v22  ;;  %v1536_v27 = vsel %vm652_vm8, %v1535_v25, %v1938_v21  ;;  %v1707_v21 = vperm.slane %v2581_v14, 6 }
 0xde5   :  { %v1537_v31 = vpack.c.bf16 %v1536_v27, %v1296_v30 }
 0xde7   :  { %1836 = vmatmul.msk.bf16.vlgmr.msra.gmra.mxu2 %vm352_vm7, %v1537_v31 }
 0xe6a   :  { %v1567_v34 = vpop.f32.mrf.mxu2 }
 0xe6b   :  { %v1568_v38 = vadd.f32 %v1567_v34, %v1542_v36 }
 0xe72   :  { %v1569_v37 = vpop.f32.mrf.mxu2 }
 0xe73   :  { %v1570_v39 = vadd.f32 %v1569_v37, %v1542_v36 }
 0xe75   :  { %v1572_v41 = vpack.c.bf16 %v1570_v39, %v1568_v38 }
 0xe77   :  { %1845 = vmatmul.msk.bf16.vlgmr.msra.gmra.mxu3 %vm352_vm7, %v1572_v41 }
 0xefa   :  { %v1602_v46 = vpop.f32.mrf.mxu3 }
 0xefb   :  { %v1603_v13 = vadd.f32 %v1602_v46, %v1577_v49 }
 0xefd   :  { %v1607_v51 = vmax.f32 %v1603_v13, 0.0 }
 0xf02   :  { %v1604_v47 = vpop.f32.mrf.mxu3 }
 0xf03   :  { %v1605_v50 = vadd.f32 %v1604_v47, %v1577_v49 }
 0xf05   :  { %v1608_v35 = vmax.f32 %v1605_v50, 0.0 }
 0xf07   :  { %v1609_v3 = vpack.c.bf16 %v1608_v35, %v1607_v51 }
 0xf09   :  { %1862 = vmatmul.msk.bf16.vlgmr.msrb.gmra.mxu0 %vm1643_vm0, %v1609_v3 }
 0xf86   :  { %v1656_v55 = vpop.f32.mrf.mxu0 }
 0xf87   :  { %v1657_v48 = vadd.f32 %v1656_v55, %v1618_v54 }
 0xf89   :  { %v1661_v56 = vadd.f32 %v1657_v48, %v2585_v26 }
 0xf8b   :  { %v1663_v57 = vsel %vm352_vm7, %v1661_v56, 0.0 }
 0xf8c   :  { %1664 = vadd.xlane.f32.xlu1 %v1663_v57 }
 0xf8e   :  { %v1658_v58 = vpop.f32.mrf.mxu0 }
 0xf8f   :  { %v1659_v59 = vadd.f32 %v1658_v58, %v1618_v54 }
 0xf91   :  { %v1662_v52 = vadd.f32 %v1659_v59, %v2587_v28 }
 0xf93   :  { %v1666_v60 = vsel %vm352_vm7, %v1662_v52, 0.0 }
 0xf94   :  { %1667 = vadd.xlane.f32.xlu0 %v1666_v60 }
 0xfff   :  { %v1665_v61 = vpop.xlane.xlu1 %1664 }
0x1000   :  { %v1669_v62 = vmul.f32 %v1665_v61, %v2570_v2 }
0x1002   :  { %v1671_v63 = vsub.f32 %v1661_v56, %v1669_v62 }
0x1004   :  { %v1673_v53 = vmul.f32 %v1671_v63, %v1671_v63 }
0x1006   :  { %v1675_v0 = vsel %vm352_vm7, %v1673_v53, 0.0 }
0x1007   :  { %v1668_v1 = vpop.xlane.xlu0 %1667  ;;  %1676 = vadd.xlane.f32.xlu2 %v1675_v0 }
0x1008   :  { %v1670_v26 = vmul.f32 %v1668_v1, %v2570_v2 }
0x100a   :  { %v1672_v4 = vsub.f32 %v1662_v52, %v1670_v26 }
0x100c   :  { %v1674_v5 = vmul.f32 %v1672_v4, %v1672_v4 }
0x100e   :  { %v1678_v6 = vsel %vm352_vm7, %v1674_v5, 0.0 }
0x100f   :  { %1679 = vadd.xlane.f32.xlu1 %v1678_v6 }
0x107a   :  { %v1677_v28 = vpop.xlane.xlu2 %1676 }
0x107b   :  { %v1681_v7 = vmul.f32 %v1677_v28, %v2570_v2 }
0x107d   :  { %v1683_v8 = vadd.f32 1e-05, %v1681_v7 }
0x107f   :  { %2009 = vrsqrt.f32 %v1683_v8  ;;  %vm1691_vm2 = vweird.f32 %v1683_v8 }
0x1082   :  { %v1680_v9 = vpop.xlane.xlu1 %1679 }
0x1083   :  { %v1682_v10 = vmul.f32 %v1680_v9, %v2570_v2 }
0x1085   :  { %v2010_v11 = vpop.eup %2009  ;;  %v1684_v32 = vadd.f32 1e-05, %v1682_v10 }
0x1086   :  { %v1686_v12 = vmul.f32 %v2010_v11, %v1683_v8  ;;  %vm1692_vm1 = vweird.f32 %v2010_v11 }
0x1087   :  { %2011 = vrsqrt.f32 %v1684_v32  ;;  %vm1693_vm3 = vmor %vm1691_vm2, %vm1692_vm1  ;;  %vm1701_vm5 = vweird.f32 %v1684_v32 }
0x1088   :  { %v1687_v15 = vmul.f32 %v2010_v11, %v1686_v12 }
0x108a   :  { %v1688_v16 = vmul.f32 0.5, %v1687_v15 }
0x108c   :  { %v1689_v40 = vsub.f32 1.5, %v1688_v16 }
0x108d   :  { %v2012_v17 = vpop.eup %2011 }
0x108e   :  { %v1690_v18 = vmul.f32 %v2010_v11, %v1689_v40  ;;  %v1696_v20 = vmul.f32 %v2012_v17, %v1684_v32  ;;  %vm1702_vm4 = vweird.f32 %v2012_v17 }
0x108f   :  { %vm1703_vm6 = vmor %vm1701_vm5, %vm1702_vm4 }
0x1090   :  { %v1694_v22 = vsel %vm1693_vm3, %v2010_v11, %v1690_v18  ;;  %v1697_v23 = vmul.f32 %v2012_v17, %v1696_v20 }
0x1091   :  { %v1705_v2 = vmul.f32 %v1694_v22, %v1671_v63 }
0x1092   :  { %v1698_v25 = vmul.f32 0.5, %v1697_v23 }
0x1093   :  { %v1708_v29 = vmul.f32 %v1707_v21, %v1705_v2 }
0x1094   :  { %v1699_v30 = vsub.f32 1.5, %v1698_v25 }
0x1095   :  { %v1711_v27 = vadd.f32 %v1710_v24, %v1708_v29 }
0x1096   :  { %v1700_v31 = vmul.f32 %v2012_v17, %v1699_v30 }
0x1097   :  { %1713 = vst.msk [vmem:[#allocation16] sm:$0xff] %vm352_vm7, %v1711_v27 }
0x1098   :  { %v1704_v19 = vsel %vm1703_vm6, %v2012_v17, %v1700_v31 }
0x1099   :  { %v1706_v33 = vmul.f32 %v1704_v19, %v1672_v4 }
0x109b   :  { %v1709_v14 = vmul.f32 %v1707_v21, %v1706_v33 }
0x109d   :  { %v1712_v34 = vadd.f32 %v1710_v24, %v1709_v14 }
0x109f   :  { %1714 = vst.msk [vmem:[#allocation16 + $0x8] sm:$0xff] %vm352_vm7, %v1712_v34 }
0x10a0   :  { %1727 = dma.vmem_to_hbm [thread:$0]  %s1720_s21, 256, %s1722_s6, [#allocation4], %s2267_s7, %s2267_s7, %s2259_s24  }
0x10a1   :  { %2239 = dma.done.wait [#allocation4], 256  }
0x10a2   :  { %2240 = vsyncadd [#allocation4], 4294967040 }
0x10a3   :  { %1732 = vsyncpa [#allocation3], 1 }
0x10a4   :  { %1733 = vsyncpa [#allocation6], 1 }
0x10a5   :  { %1734 = vsyncpa [#allocation9], 1 }
0x10a6   :  { %1735 = vsyncpa [#allocation12], 1 }
0x10a7   :  { %1736 = vsyncpa [#allocation15], 1 }
0x10a8   :  { %1737 = vsyncpa [#allocation4], 1 }

</bundles_post_ra>
